<compile_context>
chip_gen: v7x
topology: tpu7x:2x2x1
jax: 0.10.0
libtpu: 0.0.40
codegen_flags: <defaults>
</compile_context>

<pallas_src>
import functools

import jax
import jax.numpy as jnp
from jax.experimental import pallas as pl
from jax.experimental.pallas import tpu as pltpu


def _round_up(x, m):
    return (x + m - 1) // m * m


# ---------------------------------------------------------------------------
# Fused Pallas kernel: conv-GEMM + BN(batch stats) + affine + LeakyReLU
# ---------------------------------------------------------------------------
def _fused_layer_kernel(a_ref, w_ref, gb_ref, o_ref, *,
                        m_real, negative_slope, apply_act):
    # a : (M_pad, K)  bf16 -- im2col patches (padded rows are exact zeros)
    # w : (K, Cp)     bf16 -- weight matrix, Cout zero-padded to Cp lanes
    # gb: (2, Cp)     f32  -- row 0 = gamma, row 1 = beta (zero-padded)
    # o : (M_pad, Cp)      -- normalized (+ optional LeakyReLU) output
    y = jnp.dot(a_ref[...], w_ref[...],
                preferred_element_type=jnp.float32)          # (M_pad, Cp) f32

    # Training-mode BatchNorm statistics (biased variance), per channel.
    # Padded rows / channels contribute exact zeros to both sums.
    inv_m = 1.0 / m_real
    s1 = jnp.sum(y, axis=0, keepdims=True)                   # (1, Cp)
    s2 = jnp.sum(y * y, axis=0, keepdims=True)               # (1, Cp)
    mean = s1 * inv_m
    var = jnp.maximum(s2 * inv_m - mean * mean, 0.0)
    inv_std = jax.lax.rsqrt(var + 1e-5)                      # EUP

    gamma = gb_ref[0:1, :]
    beta = gb_ref[1:2, :]
    scale = gamma * inv_std
    shift = beta - mean * scale

    z = y * scale + shift
    if apply_act:
        # LeakyReLU(0.2): identical to max(z, 0.2*z) for slope in (0, 1).
        z = jnp.maximum(z, z * negative_slope)
    o_ref[...] = z.astype(o_ref.dtype)


def fused_conv_bn_act(a, w_p, gb_p, m_real, apply_act, out_dtype):
    """a: (M_pad, K) bf16, w_p: (K, Cp) bf16, gb_p: (2, Cp) f32."""
    M_pad, K = a.shape
    Cp = w_p.shape[1]
    kernel = functools.partial(_fused_layer_kernel, m_real=float(m_real),
                               negative_slope=0.2, apply_act=apply_act)
    return pl.pallas_call(
        kernel,
        out_shape=jax.ShapeDtypeStruct((M_pad, Cp), out_dtype),
        grid=(1,),
        in_specs=[
            pl.BlockSpec((M_pad, K), lambda i: (0, 0)),
            pl.BlockSpec((K, Cp), lambda i: (0, 0)),
            pl.BlockSpec((2, Cp), lambda i: (0, 0)),
        ],
        out_specs=pl.BlockSpec((M_pad, Cp), lambda i: (0, 0)),
        compiler_params=pltpu.CompilerParams(
            dimension_semantics=("arbitrary",)),
    )(a, w_p, gb_p)


# ---------------------------------------------------------------------------
# Glue: im2col for 4x4 / stride 2 / pad 1 conv (pure strided slicing)
# ---------------------------------------------------------------------------
def im2col_4x4_s2_p1(x_nhwc):
    N, H, W, C = x_nhwc.shape
    Ho, Wo = H // 2, W // 2
    xp = jnp.pad(x_nhwc, ((0, 0), (1, 1), (1, 1), (0, 0)))
    taps = [xp[:, kh:kh + 2 * Ho:2, kw:kw + 2 * Wo:2, :]
            for kh in range(4) for kw in range(4)]
    # K layout: tap-major (kh*4+kw), channel-minor -- matches weight reshape.
    p = jnp.concatenate(taps, axis=-1)        # (N, Ho, Wo, 16*C)
    return p.reshape(N * Ho * Wo, 16 * C), Ho, Wo


def down_layer(x_nhwc, w_oihw, gamma, beta, apply_act, out_dtype):
    """One Conv(4,2,1) + BatchNorm(training stats) [+ LeakyReLU(0.2)] block."""
    N = x_nhwc.shape[0]
    Cout, Cin = w_oihw.shape[0], w_oihw.shape[1]

    a, Ho, Wo = im2col_4x4_s2_p1(x_nhwc)          # (M, 16*Cin) bf16
    M = N * Ho * Wo
    M_pad = _round_up(M, 8)
    if M_pad != M:
        a = jnp.pad(a, ((0, M_pad - M), (0, 0)))

    # Lane-dense output: pad Cout up to a multiple of 128 lanes.
    Cp = _round_up(max(Cout, 128), 128)
    # (Cout, Cin, kh, kw) -> (kh, kw, Cin, Cout) -> (16*Cin, Cout), matching im2col.
    w_mat = jnp.transpose(w_oihw, (2, 3, 1, 0)).reshape(16 * Cin, Cout)
    w_p = jnp.pad(w_mat, ((0, 0), (0, Cp - Cout))).astype(jnp.bfloat16)
    gb = jnp.stack([gamma, beta], axis=0).astype(jnp.float32)      # (2, Cout)
    gb_p = jnp.pad(gb, ((0, 0), (0, Cp - Cout)))                   # (2, Cp)

    z = fused_conv_bn_act(a, w_p, gb_p, M, apply_act, out_dtype)
    return z[:M, :Cout].reshape(N, Ho, Wo, Cout)


# ---------------------------------------------------------------------------
# Parameters & forward
# ---------------------------------------------------------------------------
def init_params(key, input_channels, num_filters):
    chans = [input_channels, num_filters, num_filters * 2,
             num_filters * 4, num_filters * 8]
    params = []
    for li in range(4):
        cin, cout = chans[li], chans[li + 1]
        k_w, k_b, k_g, k_be, key = jax.random.split(key, 5)
        w = 0.05 * jax.random.normal(k_w, (cout, cin, 4, 4), jnp.float32)
        # Conv bias exists in the PyTorch module but cancels exactly under
        # training-mode BatchNorm; it is carried only for the reference check.
        b = 0.05 * jax.random.normal(k_b, (cout,), jnp.float32)
        gamma = 1.0 + 0.05 * jax.random.normal(k_g, (cout,), jnp.float32)
        beta = 0.05 * jax.random.normal(k_be, (cout,), jnp.float32)
        params.append((w, b, gamma, beta))
    return params


def downsampler_forward(x_nchw, params):
    # NCHW -> NHWC; activations stay bf16 (they only feed bf16 MXU matmuls).
    x = jnp.transpose(x_nchw, (0, 2, 3, 1)).astype(jnp.bfloat16)
    n_layers = len(params)
    for li, (w, _b, gamma, beta) in enumerate(params):
        apply_act = li < n_layers - 1          # last block: BN only, no LeakyReLU
        out_dtype = jnp.bfloat16 if apply_act else jnp.float32
        x = down_layer(x, w, gamma, beta, apply_act, out_dtype)
    # NHWC -> NCHW
    return jnp.transpose(x, (0, 3, 1, 2))


# Pure-XLA reference (same bf16 operand rounding as the kernel path, but WITH
# the conv bias) used only for the numerical self-check in __main__.
def downsampler_reference(x_nchw, params):
    x = jnp.transpose(x_nchw, (0, 2, 3, 1)).astype(jnp.bfloat16)
    n_layers = len(params)
    for li, (w, b, gamma, beta) in enumerate(params):
        x32 = x.astype(jnp.float32)
        w32 = w.astype(jnp.bfloat16).astype(jnp.float32)
        w_hwio = jnp.transpose(w32, (2, 3, 1, 0))
        y = jax.lax.conv_general_dilated(
            x32, w_hwio, window_strides=(2, 2), padding=((1, 1), (1, 1)),
            dimension_numbers=("NHWC", "HWIO", "NHWC")) + b
        mean = jnp.mean(y, axis=(0, 1, 2))
        var = jnp.var(y, axis=(0, 1, 2))
        y = (y - mean) * jax.lax.rsqrt(var + 1e-5) * gamma + beta
        if li < n_layers - 1:
            y = jnp.where(y >= 0, y, 0.2 * y)
            x = y.astype(jnp.bfloat16)
        else:
            x = y
    return jnp.transpose(x, (0, 3, 1, 2)).astype(jnp.float32)


if __name__ == "__main__":
    key = jax.random.PRNGKey(0)
    k_x, k_p = jax.random.split(key)

    batch, input_channels, spatial = 2, 4, 32
    num_filters = 8

    x = jax.random.normal(k_x, (batch, input_channels, spatial, spatial),
                          jnp.float32)
    params = init_params(k_p, input_channels, num_filters)

    out = jax.jit(downsampler_forward)(x, params)
    out = jax.block_until_ready(out)

    expected = (batch, num_filters * 8, spatial // 16, spatial // 16)
    assert out.shape == expected, (out.shape, expected)
    assert bool(jnp.all(jnp.isfinite(out)))

    ref = jax.block_until_ready(downsampler_reference(x, params))
    max_err = float(jnp.max(jnp.abs(out - ref)))
    assert max_err < 1e-1, f"max abs error vs reference: {max_err}"

    print("KERNEL_OK")
</pallas_src>

<mosaic_0001>
module attributes {stable_mosaic.version = 11 : i64} {
  func.func @_fused_layer_kernel(%arg0: i32, %arg1: memref<512x64xbf16, #tpu.memory_space<vmem>>, %arg2: memref<64x128xbf16, #tpu.memory_space<vmem>>, %arg3: memref<2x128xf32, #tpu.memory_space<vmem>>, %arg4: memref<512x128xbf16, #tpu.memory_space<vmem>>) attributes {dimension_semantics = [#tpu.dimension_semantics<arbitrary>], iteration_bounds = array<i64: 1>, scalar_prefetch = 0 : i64, scratch_operands = 0 : i64, tpu.core_type = #tpu.core_type<tc>, window_params = [{pipeline_mode = #tpu.pipeline_mode<synchronous>, transform_indices = @transform_0, window_bounds = array<i64: 512, 64>}, {pipeline_mode = #tpu.pipeline_mode<synchronous>, transform_indices = @transform_1, window_bounds = array<i64: 64, 128>}, {pipeline_mode = #tpu.pipeline_mode<synchronous>, transform_indices = @transform_2, window_bounds = array<i64: 2, 128>}, {pipeline_mode = #tpu.pipeline_mode<synchronous>, transform_indices = @transform_3, window_bounds = array<i64: 512, 128>}]} {
    %c0 = arith.constant 0 : index
    %c0_0 = arith.constant 0 : index
    %0 = vector.load %arg1[%c0, %c0_0] : memref<512x64xbf16, #tpu.memory_space<vmem>>, vector<512x64xbf16>
    %c0_1 = arith.constant 0 : index
    %c0_2 = arith.constant 0 : index
    %1 = vector.load %arg2[%c0_1, %c0_2] : memref<64x128xbf16, #tpu.memory_space<vmem>>, vector<64x128xbf16>
    %cst = arith.constant dense<0.000000e+00> : vector<512x128xf32>
    %2 = tpu.matmul %0, %1, %cst {dimension_numbers = #tpu.dot_dimension_numbers<[1], [0], [0], [1], [0, 0, 1, 1], [], []>} : vector<512x64xbf16>, vector<64x128xbf16>, vector<512x128xf32> -> vector<512x128xf32>
    %cst_3 = arith.constant dense<0.000000e+00> : vector<128xf32>
    %3 = vector.multi_reduction <add>, %2, %cst_3 [0] : vector<512x128xf32> to vector<128xf32>
    %4 = vector.shape_cast %3 : vector<128xf32> to vector<1x128xf32>
    %5 = arith.mulf %2, %2 : vector<512x128xf32>
    %cst_4 = arith.constant dense<0.000000e+00> : vector<128xf32>
    %6 = vector.multi_reduction <add>, %5, %cst_4 [0] : vector<512x128xf32> to vector<128xf32>
    %7 = vector.shape_cast %6 : vector<128xf32> to vector<1x128xf32>
    %cst_5 = arith.constant 0.001953125 : f32
    %8 = vector.broadcast %cst_5 : f32 to vector<1x128xf32>
    %9 = arith.mulf %4, %8 : vector<1x128xf32>
    %cst_6 = arith.constant 0.001953125 : f32
    %10 = vector.broadcast %cst_6 : f32 to vector<1x128xf32>
    %11 = arith.mulf %7, %10 : vector<1x128xf32>
    %12 = arith.mulf %9, %9 : vector<1x128xf32>
    %13 = arith.subf %11, %12 : vector<1x128xf32>
    %cst_7 = arith.constant 0.000000e+00 : f32
    %14 = vector.broadcast %cst_7 : f32 to vector<1x128xf32>
    %15 = arith.maximumf %13, %14 : vector<1x128xf32>
    %cst_8 = arith.constant 9.99999974E-6 : f32
    %16 = vector.broadcast %cst_8 : f32 to vector<1x128xf32>
    %17 = arith.addf %15, %16 : vector<1x128xf32>
    %18 = math.rsqrt %17 : vector<1x128xf32>
    %c0_9 = arith.constant 0 : index
    %c0_10 = arith.constant 0 : index
    %19 = vector.load %arg3[%c0_9, %c0_10] : memref<2x128xf32, #tpu.memory_space<vmem>>, vector<1x128xf32>
    %c1 = arith.constant 1 : index
    %c0_11 = arith.constant 0 : index
    %20 = vector.load %arg3[%c1, %c0_11] : memref<2x128xf32, #tpu.memory_space<vmem>>, vector<1x128xf32>
    %21 = arith.mulf %19, %18 : vector<1x128xf32>
    %22 = arith.mulf %9, %21 : vector<1x128xf32>
    %23 = arith.subf %20, %22 : vector<1x128xf32>
    %24 = vector.broadcast %21 : vector<1x128xf32> to vector<512x128xf32>
    %25 = arith.mulf %2, %24 : vector<512x128xf32>
    %26 = vector.broadcast %23 : vector<1x128xf32> to vector<512x128xf32>
    %27 = arith.addf %25, %26 : vector<512x128xf32>
    %cst_12 = arith.constant 2.000000e-01 : f32
    %28 = vector.broadcast %cst_12 : f32 to vector<512x128xf32>
    %29 = arith.mulf %27, %28 : vector<512x128xf32>
    %30 = arith.maximumf %27, %29 : vector<512x128xf32>
    %31 = arith.truncf %30 : vector<512x128xf32> to vector<512x128xbf16>
    %c0_13 = arith.constant 0 : index
    %c0_14 = arith.constant 0 : index
    %32 = vector.load %arg4[%c0_13, %c0_14] : memref<512x128xbf16, #tpu.memory_space<vmem>>, vector<512x128xbf16>
    tpu.vector_store %arg4[%c0_13, %c0_14], %31 {strides = array<i32>} : memref<512x128xbf16, #tpu.memory_space<vmem>>, vector<512x128xbf16>,
    return
  }
  func.func @transform_0(%arg0: i32) -> (i32, i32) {
    %c0_i32 = arith.constant 0 : i32
    %c0_i32_0 = arith.constant 0 : i32
    %c0_i32_1 = arith.constant 0 : i32
    return %c0_i32, %c0_i32_0 : i32, i32
  }
  func.func @transform_1(%arg0: i32) -> (i32, i32) {
    %c0_i32 = arith.constant 0 : i32
    %c0_i32_0 = arith.constant 0 : i32
    %c0_i32_1 = arith.constant 0 : i32
    return %c0_i32, %c0_i32_0 : i32, i32
  }
  func.func @transform_2(%arg0: i32) -> (i32, i32) {
    %c0_i32 = arith.constant 0 : i32
    %c0_i32_0 = arith.constant 0 : i32
    %c0_i32_1 = arith.constant 0 : i32
    return %c0_i32, %c0_i32_0 : i32, i32
  }
  func.func @transform_3(%arg0: i32) -> (i32, i32) {
    %c0_i32 = arith.constant 0 : i32
    %c0_i32_0 = arith.constant 0 : i32
    %c0_i32_1 = arith.constant 0 : i32
    return %c0_i32, %c0_i32_0 : i32, i32
  }
}

module attributes {stable_mosaic.version = 11 : i64} {
  func.func @_fused_layer_kernel(%arg0: i32, %arg1: memref<128x128xbf16, #tpu.memory_space<vmem>>, %arg2: memref<128x128xbf16, #tpu.memory_space<vmem>>, %arg3: memref<2x128xf32, #tpu.memory_space<vmem>>, %arg4: memref<128x128xbf16, #tpu.memory_space<vmem>>) attributes {dimension_semantics = [#tpu.dimension_semantics<arbitrary>], iteration_bounds = array<i64: 1>, scalar_prefetch = 0 : i64, scratch_operands = 0 : i64, tpu.core_type = #tpu.core_type<tc>, window_params = [{pipeline_mode = #tpu.pipeline_mode<synchronous>, transform_indices = @transform_0, window_bounds = array<i64: 128, 128>}, {pipeline_mode = #tpu.pipeline_mode<synchronous>, transform_indices = @transform_1, window_bounds = array<i64: 128, 128>}, {pipeline_mode = #tpu.pipeline_mode<synchronous>, transform_indices = @transform_2, window_bounds = array<i64: 2, 128>}, {pipeline_mode = #tpu.pipeline_mode<synchronous>, transform_indices = @transform_3, window_bounds = array<i64: 128, 128>}]} {
    %c0 = arith.constant 0 : index
    %c0_0 = arith.constant 0 : index
    %0 = vector.load %arg1[%c0, %c0_0] : memref<128x128xbf16, #tpu.memory_space<vmem>>, vector<128x128xbf16>
    %c0_1 = arith.constant 0 : index
    %c0_2 = arith.constant 0 : index
    %1 = vector.load %arg2[%c0_1, %c0_2] : memref<128x128xbf16, #tpu.memory_space<vmem>>, vector<128x128xbf16>
    %cst = arith.constant dense<0.000000e+00> : vector<128x128xf32>
    %2 = tpu.matmul %0, %1, %cst {dimension_numbers = #tpu.dot_dimension_numbers<[1], [0], [0], [1], [0, 0, 1, 1], [], []>} : vector<128x128xbf16>, vector<128x128xbf16>, vector<128x128xf32> -> vector<128x128xf32>
    %cst_3 = arith.constant dense<0.000000e+00> : vector<128xf32>
    %3 = vector.multi_reduction <add>, %2, %cst_3 [0] : vector<128x128xf32> to vector<128xf32>
    %4 = vector.shape_cast %3 : vector<128xf32> to vector<1x128xf32>
    %5 = arith.mulf %2, %2 : vector<128x128xf32>
    %cst_4 = arith.constant dense<0.000000e+00> : vector<128xf32>
    %6 = vector.multi_reduction <add>, %5, %cst_4 [0] : vector<128x128xf32> to vector<128xf32>
    %7 = vector.shape_cast %6 : vector<128xf32> to vector<1x128xf32>
    %cst_5 = arith.constant 7.812500e-03 : f32
    %8 = vector.broadcast %cst_5 : f32 to vector<1x128xf32>
    %9 = arith.mulf %4, %8 : vector<1x128xf32>
    %cst_6 = arith.constant 7.812500e-03 : f32
    %10 = vector.broadcast %cst_6 : f32 to vector<1x128xf32>
    %11 = arith.mulf %7, %10 : vector<1x128xf32>
    %12 = arith.mulf %9, %9 : vector<1x128xf32>
    %13 = arith.subf %11, %12 : vector<1x128xf32>
    %cst_7 = arith.constant 0.000000e+00 : f32
    %14 = vector.broadcast %cst_7 : f32 to vector<1x128xf32>
    %15 = arith.maximumf %13, %14 : vector<1x128xf32>
    %cst_8 = arith.constant 9.99999974E-6 : f32
    %16 = vector.broadcast %cst_8 : f32 to vector<1x128xf32>
    %17 = arith.addf %15, %16 : vector<1x128xf32>
    %18 = math.rsqrt %17 : vector<1x128xf32>
    %c0_9 = arith.constant 0 : index
    %c0_10 = arith.constant 0 : index
    %19 = vector.load %arg3[%c0_9, %c0_10] : memref<2x128xf32, #tpu.memory_space<vmem>>, vector<1x128xf32>
    %c1 = arith.constant 1 : index
    %c0_11 = arith.constant 0 : index
    %20 = vector.load %arg3[%c1, %c0_11] : memref<2x128xf32, #tpu.memory_space<vmem>>, vector<1x128xf32>
    %21 = arith.mulf %19, %18 : vector<1x128xf32>
    %22 = arith.mulf %9, %21 : vector<1x128xf32>
    %23 = arith.subf %20, %22 : vector<1x128xf32>
    %24 = vector.broadcast %21 : vector<1x128xf32> to vector<128x128xf32>
    %25 = arith.mulf %2, %24 : vector<128x128xf32>
    %26 = vector.broadcast %23 : vector<1x128xf32> to vector<128x128xf32>
    %27 = arith.addf %25, %26 : vector<128x128xf32>
    %cst_12 = arith.constant 2.000000e-01 : f32
    %28 = vector.broadcast %cst_12 : f32 to vector<128x128xf32>
    %29 = arith.mulf %27, %28 : vector<128x128xf32>
    %30 = arith.maximumf %27, %29 : vector<128x128xf32>
    %31 = arith.truncf %30 : vector<128x128xf32> to vector<128x128xbf16>
    %c0_13 = arith.constant 0 : index
    %c0_14 = arith.constant 0 : index
    %32 = vector.load %arg4[%c0_13, %c0_14] : memref<128x128xbf16, #tpu.memory_space<vmem>>, vector<128x128xbf16>
    tpu.vector_store %arg4[%c0_13, %c0_14], %31 {strides = array<i32>} : memref<128x128xbf16, #tpu.memory_space<vmem>>, vector<128x128xbf16>,
    return
  }
  func.func @transform_0(%arg0: i32) -> (i32, i32) {
    %c0_i32 = arith.constant 0 : i32
    %c0_i32_0 = arith.constant 0 : i32
    %c0_i32_1 = arith.constant 0 : i32
    return %c0_i32, %c0_i32_0 : i32, i32
  }
  func.func @transform_1(%arg0: i32) -> (i32, i32) {
    %c0_i32 = arith.constant 0 : i32
    %c0_i32_0 = arith.constant 0 : i32
    %c0_i32_1 = arith.constant 0 : i32
    return %c0_i32, %c0_i32_0 : i32, i32
  }
  func.func @transform_2(%arg0: i32) -> (i32, i32) {
    %c0_i32 = arith.constant 0 : i32
    %c0_i32_0 = arith.constant 0 : i32
    %c0_i32_1 = arith.constant 0 : i32
    return %c0_i32, %c0_i32_0 : i32, i32
  }
  func.func @transform_3(%arg0: i32) -> (i32, i32) {
    %c0_i32 = arith.constant 0 : i32
    %c0_i32_0 = arith.constant 0 : i32
    %c0_i32_1 = arith.constant 0 : i32
    return %c0_i32, %c0_i32_0 : i32, i32
  }
}

module attributes {stable_mosaic.version = 11 : i64} {
  func.func @_fused_layer_kernel(%arg0: i32, %arg1: memref<32x256xbf16, #tpu.memory_space<vmem>>, %arg2: memref<256x128xbf16, #tpu.memory_space<vmem>>, %arg3: memref<2x128xf32, #tpu.memory_space<vmem>>, %arg4: memref<32x128xbf16, #tpu.memory_space<vmem>>) attributes {dimension_semantics = [#tpu.dimension_semantics<arbitrary>], iteration_bounds = array<i64: 1>, scalar_prefetch = 0 : i64, scratch_operands = 0 : i64, tpu.core_type = #tpu.core_type<tc>, window_params = [{pipeline_mode = #tpu.pipeline_mode<synchronous>, transform_indices = @transform_0, window_bounds = array<i64: 32, 256>}, {pipeline_mode = #tpu.pipeline_mode<synchronous>, transform_indices = @transform_1, window_bounds = array<i64: 256, 128>}, {pipeline_mode = #tpu.pipeline_mode<synchronous>, transform_indices = @transform_2, window_bounds = array<i64: 2, 128>}, {pipeline_mode = #tpu.pipeline_mode<synchronous>, transform_indices = @transform_3, window_bounds = array<i64: 32, 128>}]} {
    %c0 = arith.constant 0 : index
    %c0_0 = arith.constant 0 : index
    %0 = vector.load %arg1[%c0, %c0_0] : memref<32x256xbf16, #tpu.memory_space<vmem>>, vector<32x256xbf16>
    %c0_1 = arith.constant 0 : index
    %c0_2 = arith.constant 0 : index
    %1 = vector.load %arg2[%c0_1, %c0_2] : memref<256x128xbf16, #tpu.memory_space<vmem>>, vector<256x128xbf16>
    %cst = arith.constant dense<0.000000e+00> : vector<32x128xf32>
    %2 = tpu.matmul %0, %1, %cst {dimension_numbers = #tpu.dot_dimension_numbers<[1], [0], [0], [1], [0, 0, 1, 1], [], []>} : vector<32x256xbf16>, vector<256x128xbf16>, vector<32x128xf32> -> vector<32x128xf32>
    %cst_3 = arith.constant dense<0.000000e+00> : vector<128xf32>
    %3 = vector.multi_reduction <add>, %2, %cst_3 [0] : vector<32x128xf32> to vector<128xf32>
    %4 = vector.shape_cast %3 : vector<128xf32> to vector<1x128xf32>
    %5 = arith.mulf %2, %2 : vector<32x128xf32>
    %cst_4 = arith.constant dense<0.000000e+00> : vector<128xf32>
    %6 = vector.multi_reduction <add>, %5, %cst_4 [0] : vector<32x128xf32> to vector<128xf32>
    %7 = vector.shape_cast %6 : vector<128xf32> to vector<1x128xf32>
    %cst_5 = arith.constant 3.125000e-02 : f32
    %8 = vector.broadcast %cst_5 : f32 to vector<1x128xf32>
    %9 = arith.mulf %4, %8 : vector<1x128xf32>
    %cst_6 = arith.constant 3.125000e-02 : f32
    %10 = vector.broadcast %cst_6 : f32 to vector<1x128xf32>
    %11 = arith.mulf %7, %10 : vector<1x128xf32>
    %12 = arith.mulf %9, %9 : vector<1x128xf32>
    %13 = arith.subf %11, %12 : vector<1x128xf32>
    %cst_7 = arith.constant 0.000000e+00 : f32
    %14 = vector.broadcast %cst_7 : f32 to vector<1x128xf32>
    %15 = arith.maximumf %13, %14 : vector<1x128xf32>
    %cst_8 = arith.constant 9.99999974E-6 : f32
    %16 = vector.broadcast %cst_8 : f32 to vector<1x128xf32>
    %17 = arith.addf %15, %16 : vector<1x128xf32>
    %18 = math.rsqrt %17 : vector<1x128xf32>
    %c0_9 = arith.constant 0 : index
    %c0_10 = arith.constant 0 : index
    %19 = vector.load %arg3[%c0_9, %c0_10] : memref<2x128xf32, #tpu.memory_space<vmem>>, vector<1x128xf32>
    %c1 = arith.constant 1 : index
    %c0_11 = arith.constant 0 : index
    %20 = vector.load %arg3[%c1, %c0_11] : memref<2x128xf32, #tpu.memory_space<vmem>>, vector<1x128xf32>
    %21 = arith.mulf %19, %18 : vector<1x128xf32>
    %22 = arith.mulf %9, %21 : vector<1x128xf32>
    %23 = arith.subf %20, %22 : vector<1x128xf32>
    %24 = vector.broadcast %21 : vector<1x128xf32> to vector<32x128xf32>
    %25 = arith.mulf %2, %24 : vector<32x128xf32>
    %26 = vector.broadcast %23 : vector<1x128xf32> to vector<32x128xf32>
    %27 = arith.addf %25, %26 : vector<32x128xf32>
    %cst_12 = arith.constant 2.000000e-01 : f32
    %28 = vector.broadcast %cst_12 : f32 to vector<32x128xf32>
    %29 = arith.mulf %27, %28 : vector<32x128xf32>
    %30 = arith.maximumf %27, %29 : vector<32x128xf32>
    %31 = arith.truncf %30 : vector<32x128xf32> to vector<32x128xbf16>
    %c0_13 = arith.constant 0 : index
    %c0_14 = arith.constant 0 : index
    %32 = vector.load %arg4[%c0_13, %c0_14] : memref<32x128xbf16, #tpu.memory_space<vmem>>, vector<32x128xbf16>
    tpu.vector_store %arg4[%c0_13, %c0_14], %31 {strides = array<i32>} : memref<32x128xbf16, #tpu.memory_space<vmem>>, vector<32x128xbf16>,
    return
  }
  func.func @transform_0(%arg0: i32) -> (i32, i32) {
    %c0_i32 = arith.constant 0 : i32
    %c0_i32_0 = arith.constant 0 : i32
    %c0_i32_1 = arith.constant 0 : i32
    return %c0_i32, %c0_i32_0 : i32, i32
  }
  func.func @transform_1(%arg0: i32) -> (i32, i32) {
    %c0_i32 = arith.constant 0 : i32
    %c0_i32_0 = arith.constant 0 : i32
    %c0_i32_1 = arith.constant 0 : i32
    return %c0_i32, %c0_i32_0 : i32, i32
  }
  func.func @transform_2(%arg0: i32) -> (i32, i32) {
    %c0_i32 = arith.constant 0 : i32
    %c0_i32_0 = arith.constant 0 : i32
    %c0_i32_1 = arith.constant 0 : i32
    return %c0_i32, %c0_i32_0 : i32, i32
  }
  func.func @transform_3(%arg0: i32) -> (i32, i32) {
    %c0_i32 = arith.constant 0 : i32
    %c0_i32_0 = arith.constant 0 : i32
    %c0_i32_1 = arith.constant 0 : i32
    return %c0_i32, %c0_i32_0 : i32, i32
  }
}

module attributes {stable_mosaic.version = 11 : i64} {
  func.func @_fused_layer_kernel(%arg0: i32, %arg1: memref<8x512xbf16, #tpu.memory_space<vmem>>, %arg2: memref<512x128xbf16, #tpu.memory_space<vmem>>, %arg3: memref<2x128xf32, #tpu.memory_space<vmem>>, %arg4: memref<8x128xf32, #tpu.memory_space<vmem>>) attributes {dimension_semantics = [#tpu.dimension_semantics<arbitrary>], iteration_bounds = array<i64: 1>, scalar_prefetch = 0 : i64, scratch_operands = 0 : i64, tpu.core_type = #tpu.core_type<tc>, window_params = [{pipeline_mode = #tpu.pipeline_mode<synchronous>, transform_indices = @transform_0, window_bounds = array<i64: 8, 512>}, {pipeline_mode = #tpu.pipeline_mode<synchronous>, transform_indices = @transform_1, window_bounds = array<i64: 512, 128>}, {pipeline_mode = #tpu.pipeline_mode<synchronous>, transform_indices = @transform_2, window_bounds = array<i64: 2, 128>}, {pipeline_mode = #tpu.pipeline_mode<synchronous>, transform_indices = @transform_3, window_bounds = array<i64: 8, 128>}]} {
    %c0 = arith.constant 0 : index
    %c0_0 = arith.constant 0 : index
    %0 = vector.load %arg1[%c0, %c0_0] : memref<8x512xbf16, #tpu.memory_space<vmem>>, vector<8x512xbf16>
    %c0_1 = arith.constant 0 : index
    %c0_2 = arith.constant 0 : index
    %1 = vector.load %arg2[%c0_1, %c0_2] : memref<512x128xbf16, #tpu.memory_space<vmem>>, vector<512x128xbf16>
    %cst = arith.constant dense<0.000000e+00> : vector<8x128xf32>
    %2 = tpu.matmul %0, %1, %cst {dimension_numbers = #tpu.dot_dimension_numbers<[1], [0], [0], [1], [0, 0, 1, 1], [], []>} : vector<8x512xbf16>, vector<512x128xbf16>, vector<8x128xf32> -> vector<8x128xf32>
    %cst_3 = arith.constant dense<0.000000e+00> : vector<128xf32>
    %3 = vector.multi_reduction <add>, %2, %cst_3 [0] : vector<8x128xf32> to vector<128xf32>
    %4 = vector.shape_cast %3 : vector<128xf32> to vector<1x128xf32>
    %5 = arith.mulf %2, %2 : vector<8x128xf32>
    %cst_4 = arith.constant dense<0.000000e+00> : vector<128xf32>
    %6 = vector.multi_reduction <add>, %5, %cst_4 [0] : vector<8x128xf32> to vector<128xf32>
    %7 = vector.shape_cast %6 : vector<128xf32> to vector<1x128xf32>
    %cst_5 = arith.constant 1.250000e-01 : f32
    %8 = vector.broadcast %cst_5 : f32 to vector<1x128xf32>
    %9 = arith.mulf %4, %8 : vector<1x128xf32>
    %cst_6 = arith.constant 1.250000e-01 : f32
    %10 = vector.broadcast %cst_6 : f32 to vector<1x128xf32>
    %11 = arith.mulf %7, %10 : vector<1x128xf32>
    %12 = arith.mulf %9, %9 : vector<1x128xf32>
    %13 = arith.subf %11, %12 : vector<1x128xf32>
    %cst_7 = arith.constant 0.000000e+00 : f32
    %14 = vector.broadcast %cst_7 : f32 to vector<1x128xf32>
    %15 = arith.maximumf %13, %14 : vector<1x128xf32>
    %cst_8 = arith.constant 9.99999974E-6 : f32
    %16 = vector.broadcast %cst_8 : f32 to vector<1x128xf32>
    %17 = arith.addf %15, %16 : vector<1x128xf32>
    %18 = math.rsqrt %17 : vector<1x128xf32>
    %c0_9 = arith.constant 0 : index
    %c0_10 = arith.constant 0 : index
    %19 = vector.load %arg3[%c0_9, %c0_10] : memref<2x128xf32, #tpu.memory_space<vmem>>, vector<1x128xf32>
    %c1 = arith.constant 1 : index
    %c0_11 = arith.constant 0 : index
    %20 = vector.load %arg3[%c1, %c0_11] : memref<2x128xf32, #tpu.memory_space<vmem>>, vector<1x128xf32>
    %21 = arith.mulf %19, %18 : vector<1x128xf32>
    %22 = arith.mulf %9, %21 : vector<1x128xf32>
    %23 = arith.subf %20, %22 : vector<1x128xf32>
    %24 = vector.broadcast %21 : vector<1x128xf32> to vector<8x128xf32>
    %25 = arith.mulf %2, %24 : vector<8x128xf32>
    %26 = vector.broadcast %23 : vector<1x128xf32> to vector<8x128xf32>
    %27 = arith.addf %25, %26 : vector<8x128xf32>
    %c0_12 = arith.constant 0 : index
    %c0_13 = arith.constant 0 : index
    %28 = vector.load %arg4[%c0_12, %c0_13] : memref<8x128xf32, #tpu.memory_space<vmem>>, vector<8x128xf32>
    tpu.vector_store %arg4[%c0_12, %c0_13], %27 {strides = array<i32>} : memref<8x128xf32, #tpu.memory_space<vmem>>, vector<8x128xf32>,
    return
  }
  func.func @transform_0(%arg0: i32) -> (i32, i32) {
    %c0_i32 = arith.constant 0 : i32
    %c0_i32_0 = arith.constant 0 : i32
    %c0_i32_1 = arith.constant 0 : i32
    return %c0_i32, %c0_i32_0 : i32, i32
  }
  func.func @transform_1(%arg0: i32) -> (i32, i32) {
    %c0_i32 = arith.constant 0 : i32
    %c0_i32_0 = arith.constant 0 : i32
    %c0_i32_1 = arith.constant 0 : i32
    return %c0_i32, %c0_i32_0 : i32, i32
  }
  func.func @transform_2(%arg0: i32) -> (i32, i32) {
    %c0_i32 = arith.constant 0 : i32
    %c0_i32_0 = arith.constant 0 : i32
    %c0_i32_1 = arith.constant 0 : i32
    return %c0_i32, %c0_i32_0 : i32, i32
  }
  func.func @transform_3(%arg0: i32) -> (i32, i32) {
    %c0_i32 = arith.constant 0 : i32
    %c0_i32_0 = arith.constant 0 : i32
    %c0_i32_1 = arith.constant 0 : i32
    return %c0_i32, %c0_i32_0 : i32, i32
  }
}

</mosaic_0001>

<bundles_post_ra>
// kernel: downsampler_forward.4
= control target key start
LH: loop header
LB: loop body
LE: loop exit
PB: predicated region body
PF: predicated region fallthrough
CT: control target
= control target key end

     0   :  { %vm271_vm0 = vcmask 523264   ;;  %s3485_s1 = inlined_call_operand.vmem [shape: bf16[64,128], index: 1, kind: input, shape index: {}]   ;;  %s3486_s0 = inlined_call_operand.vmem [shape: bf16[512,64], index: 0, kind: input, shape index: {}]   ;;  %s3487_s2 = inlined_call_operand.vmem [shape: f32[2,128], index: 2, kind: input, shape index: {}]   ;;  %s3488_s3 = inlined_call_operand.vmem [shape: bf16[512,128], index: 3, kind: output, shape index: {}]  }
   0x1   :  { %v1962_v0 = vld [vmem:[%s3485_s1] sm:$0xff]   ;;  %v1963_v1 = vld [vmem:[%s3485_s1 + $0x8] sm:$0xff]   ;;  %v1964_v2 = vld [vmem:[%s3485_s1 + $0x10] sm:$0xff]  }
   0x2   :  { %1882 = vmatprep.subr.bf16.mxu0 %v1962_v0  ;;  %1954 = vmatprep.subr.bf16.mxu1 %v1962_v0  ;;  %v1966_v3 = vld [vmem:[%s3486_s0] sm:$0xff]   ;;  %v1965_v4 = vld [vmem:[%s3485_s1 + $0x18] sm:$0xff]   ;;  %v1967_v5 = vld [vmem:[%s3486_s0 + $0x8] sm:$0xff]  }
   0x3   :  { %1883 = vmatpush3.bf16.msra.mxu0 %v1962_v0  ;;  %1958 = vmatpush3.bf16.msra.mxu1 %v1962_v0  ;;  %v1968_v6 = vld [vmem:[%s3486_s0 + $0x10] sm:$0xff]   ;;  %v1969_v7 = vld [vmem:[%s3486_s0 + $0x18] sm:$0xff]   ;;  %v1982_v8 = vld [vmem:[%s3486_s0 + $0x80] sm:$0xff]  }
   0x4   :  { %1884 = vmatprep.subr.bf16.mxu0 %v1963_v1  ;;  %1955 = vmatprep.subr.bf16.mxu1 %v1963_v1  ;;  %v1983_v9 = vld [vmem:[%s3486_s0 + $0x88] sm:$0xff]   ;;  %v1984_v10 = vld [vmem:[%s3486_s0 + $0x90] sm:$0xff]   ;;  %v1970_v11 = vld [vmem:[%s3486_s0 + $0x20] sm:$0xff]  }
   0x5   :  { %1890 = vmatprep.mubr.msk.bf16.mxu0 %vm271_vm0, %v1966_v3  ;;  %1922 = vmatprep.mubr.msk.bf16.mxu1 %vm271_vm0, %v1982_v8  ;;  %v1985_v12 = vld [vmem:[%s3486_s0 + $0x98] sm:$0xff]   ;;  %v1986_v13 = vld [vmem:[%s3486_s0 + $0xa0] sm:$0xff]   ;;  %v1971_v14 = vld [vmem:[%s3486_s0 + $0x28] sm:$0xff]  }
   0x6   :  { %v1972_v15 = vld [vmem:[%s3486_s0 + $0x30] sm:$0xff]   ;;  %v1987_v16 = vld [vmem:[%s3486_s0 + $0xa8] sm:$0xff]   ;;  %v1973_v18 = vld [vmem:[%s3486_s0 + $0x38] sm:$0xff]  }
   0x7   :  { %1885 = vmatpush3.bf16.msra.mxu0 %v1963_v1  ;;  %1959 = vmatpush3.bf16.msra.mxu1 %v1963_v1  ;;  %v1988_v17 = vld [vmem:[%s3486_s0 + $0xb0] sm:$0xff]   ;;  %v1974_v19 = vld [vmem:[%s3486_s0 + $0x40] sm:$0xff]   ;;  %v1989_v20 = vld [vmem:[%s3486_s0 + $0xb8] sm:$0xff]  }
   0x8   :  { %1886 = vmatprep.subr.bf16.mxu0 %v1964_v2  ;;  %1956 = vmatprep.subr.bf16.mxu1 %v1964_v2  ;;  %v1990_v21 = vld [vmem:[%s3486_s0 + $0xc0] sm:$0xff]   ;;  %v1975_v22 = vld [vmem:[%s3486_s0 + $0x48] sm:$0xff]   ;;  %v1976_v23 = vld [vmem:[%s3486_s0 + $0x50] sm:$0xff]  }
   0x9   :  { %v1991_v24 = vld [vmem:[%s3486_s0 + $0xc8] sm:$0xff]   ;;  %v1992_v25 = vld [vmem:[%s3486_s0 + $0xd0] sm:$0xff]   ;;  %v1977_v26 = vld [vmem:[%s3486_s0 + $0x58] sm:$0xff]  }
   0xa   :  { %v1978_v27 = vld [vmem:[%s3486_s0 + $0x60] sm:$0xff]   ;;  %v1993_v28 = vld [vmem:[%s3486_s0 + $0xd8] sm:$0xff]   ;;  %v1979_v30 = vld [vmem:[%s3486_s0 + $0x68] sm:$0xff]  }
   0xb   :  { %1887 = vmatpush3.bf16.msra.mxu0 %v1964_v2  ;;  %1960 = vmatpush3.bf16.msra.mxu1 %v1964_v2  ;;  %v1994_v29 = vld [vmem:[%s3486_s0 + $0xe0] sm:$0xff]   ;;  %v1980_v31 = vld [vmem:[%s3486_s0 + $0x70] sm:$0xff]   ;;  %v1995_v32 = vld [vmem:[%s3486_s0 + $0xe8] sm:$0xff]  }
   0xc   :  { %1888 = vmatprep.subr.bf16.mxu0 %v1965_v4  ;;  %1957 = vmatprep.subr.bf16.mxu1 %v1965_v4  ;;  %v1996_v33 = vld [vmem:[%s3486_s0 + $0xf0] sm:$0xff]   ;;  %v1981_v34 = vld [vmem:[%s3486_s0 + $0x78] sm:$0xff]  }
   0xd   :  { %v1997_v35 = vld [vmem:[%s3486_s0 + $0xf8] sm:$0xff]  }
   0xf   :  { %1889 = vmatpush3.bf16.msra.mxu0 %v1965_v4  ;;  %1961 = vmatpush3.bf16.msra.mxu1 %v1965_v4 }
  0x12   :  { %1891 = vmatmul.mubr.msk.bf16.vlgmr.msra.gmra.mrb[0].mxu0 %vm271_vm0, %v1967_v5  ;;  %1923 = vmatmul.mubr.msk.bf16.vlgmr.msra.gmra.mrb[0].mxu1 %vm271_vm0, %v1983_v9 }
  0x13   :  { %1894 = vmatprep.mubr.msk.bf16.mxu0 %vm271_vm0, %v1968_v6  ;;  %1926 = vmatprep.mubr.msk.bf16.mxu1 %vm271_vm0, %v1984_v10 }
  0x1a   :  { %1895 = vmatmul.mubr.msk.bf16.gmra.mrb[4].mxu0 %vm271_vm0, %v1969_v7  ;;  %1927 = vmatmul.mubr.msk.bf16.gmra.mrb[4].mxu1 %vm271_vm0, %v1985_v12 }
  0x1b   :  { %1898 = vmatprep.mubr.msk.bf16.mxu0 %vm271_vm0, %v1970_v11  ;;  %1930 = vmatprep.mubr.msk.bf16.mxu1 %vm271_vm0, %v1986_v13 }
  0x22   :  { %1899 = vmatmul.mubr.msk.bf16.gmra.mrb[8].mxu0 %vm271_vm0, %v1971_v14  ;;  %1931 = vmatmul.mubr.msk.bf16.gmra.mrb[8].mxu1 %vm271_vm0, %v1987_v16 }
  0x23   :  { %1902 = vmatprep.mubr.msk.bf16.mxu0 %vm271_vm0, %v1972_v15  ;;  %1934 = vmatprep.mubr.msk.bf16.mxu1 %vm271_vm0, %v1988_v17 }
  0x2a   :  { %1903 = vmatmul.mubr.msk.bf16.gmra.mrb[12].mxu0 %vm271_vm0, %v1973_v18  ;;  %1935 = vmatmul.mubr.msk.bf16.gmra.mrb[12].mxu1 %vm271_vm0, %v1989_v20 }
  0x2b   :  { %1906 = vmatprep.mubr.msk.bf16.mxu0 %vm271_vm0, %v1974_v19  ;;  %1938 = vmatprep.mubr.msk.bf16.mxu1 %vm271_vm0, %v1990_v21 }
  0x32   :  { %1907 = vmatmul.mubr.msk.bf16.gmra.mrb[16].mxu0 %vm271_vm0, %v1975_v22  ;;  %1939 = vmatmul.mubr.msk.bf16.gmra.mrb[16].mxu1 %vm271_vm0, %v1991_v24 }
  0x33   :  { %1910 = vmatprep.mubr.msk.bf16.mxu0 %vm271_vm0, %v1976_v23  ;;  %1942 = vmatprep.mubr.msk.bf16.mxu1 %vm271_vm0, %v1992_v25 }
  0x3a   :  { %1911 = vmatmul.mubr.msk.bf16.gmra.mrb[20].mxu0 %vm271_vm0, %v1977_v26  ;;  %1943 = vmatmul.mubr.msk.bf16.gmra.mrb[20].mxu1 %vm271_vm0, %v1993_v28 }
  0x3b   :  { %1914 = vmatprep.mubr.msk.bf16.mxu0 %vm271_vm0, %v1978_v27  ;;  %1946 = vmatprep.mubr.msk.bf16.mxu1 %vm271_vm0, %v1994_v29 }
  0x42   :  { %1915 = vmatmul.mubr.msk.bf16.gmra.mrb[24].mxu0 %vm271_vm0, %v1979_v30  ;;  %1947 = vmatmul.mubr.msk.bf16.gmra.mrb[24].mxu1 %vm271_vm0, %v1995_v32 }
  0x43   :  { %1918 = vmatprep.mubr.msk.bf16.mxu0 %vm271_vm0, %v1980_v31  ;;  %1950 = vmatprep.mubr.msk.bf16.mxu1 %vm271_vm0, %v1996_v33 }
  0x4a   :  { %1919 = vmatmul.mubr.msk.bf16.gmra.mrb[28].mxu0 %vm271_vm0, %v1981_v34  ;;  %1951 = vmatmul.mubr.msk.bf16.gmra.mrb[28].mxu1 %vm271_vm0, %v1997_v35 }
  0xe5   :  { %v2160_v36 = vpop.f32.mrb[0].mxu0  ;;  %v2174_v43 = vpop.f32.mrb[0].mxu1 }
  0xe6   :  { %v2162_v37 = vpop.f32.mrb[1].mxu0  ;;  %v728_v44 = vmul.f32 %v2160_v36, %v2160_v36  ;;  %v2179_v47 = vpop.f32.mrb[1].mxu1 }
  0xe7   :  { %v2164_v38 = vpop.f32.mrb[2].mxu0  ;;  %v726_v40 = vmul.f32 %v2162_v37, %v2162_v37  ;;  %v2181_v48 = vpop.f32.mrb[2].mxu1 }
  0xe8   :  { %v2166_v39 = vpop.f32.mrb[3].mxu0  ;;  %v729_v49 = vmul.f32 %v2164_v38, %v2164_v38  ;;  %v2188_v53 = vpop.f32.mrb[3].mxu1 }
  0xe9   :  { %v657_v41 = vadd.f32 %v2166_v39, %v2162_v37  ;;  %v727_v42 = vmul.f32 %v2166_v39, %v2166_v39 }
  0xeb   :  { %v658_v45 = vadd.f32 %v2160_v36, %v657_v41  ;;  %v790_v46 = vadd.f32 %v727_v42, %v726_v40 }
  0xed   :  { %v791_v50 = vadd.f32 %v790_v46, %v728_v44  ;;  %v2185_v51 = vpop.f32.mrb[4].mxu0  ;;  %v659_v52 = vadd.f32 %v2164_v38, %v658_v45  ;;  %v2202_v63 = vpop.f32.mrb[4].mxu1 }
  0xee   :  { %v2190_v54 = vpop.f32.mrb[5].mxu0  ;;  %v732_v0 = vmul.f32 %v2185_v51, %v2185_v51  ;;  %v2207_v3 = vpop.f32.mrb[5].mxu1 }
  0xef   :  { %v660_v55 = vadd.f32 %v659_v52, %v2190_v54  ;;  %v730_v56 = vmul.f32 %v2190_v54, %v2190_v54  ;;  %v792_v57 = vadd.f32 %v791_v50, %v729_v49  ;;  %v2195_v58 = vpop.f32.mrb[6].mxu0  ;;  %v2209_v4 = vpop.f32.mrb[6].mxu1 }
  0xf0   :  { %v2197_v59 = vpop.f32.mrb[7].mxu0  ;;  %v733_v5 = vmul.f32 %v2195_v58, %v2195_v58  ;;  %v2216_v9 = vpop.f32.mrb[7].mxu1 }
  0xf1   :  { %v793_v60 = vadd.f32 %v792_v57, %v730_v56  ;;  %v661_v61 = vadd.f32 %v660_v55, %v2197_v59  ;;  %v731_v62 = vmul.f32 %v2197_v59, %v2197_v59 }
  0xf3   :  { %v662_v1 = vadd.f32 %v2185_v51, %v661_v61  ;;  %v794_v2 = vadd.f32 %v793_v60, %v731_v62 }
  0xf5   :  { %v795_v6 = vadd.f32 %v794_v2, %v732_v0  ;;  %v2213_v7 = vpop.f32.mrb[8].mxu0  ;;  %v663_v8 = vadd.f32 %v2195_v58, %v662_v1  ;;  %v2230_v19 = vpop.f32.mrb[8].mxu1 }
  0xf6   :  { %v2218_v10 = vpop.f32.mrb[9].mxu0  ;;  %v736_v20 = vmul.f32 %v2213_v7, %v2213_v7  ;;  %v2235_v23 = vpop.f32.mrb[9].mxu1 }
  0xf7   :  { %v664_v11 = vadd.f32 %v663_v8, %v2218_v10  ;;  %v734_v12 = vmul.f32 %v2218_v10, %v2218_v10  ;;  %v796_v13 = vadd.f32 %v795_v6, %v733_v5  ;;  %v2223_v14 = vpop.f32.mrb[10].mxu0  ;;  %v2237_v24 = vpop.f32.mrb[10].mxu1 }
  0xf8   :  { %v2225_v15 = vpop.f32.mrb[11].mxu0  ;;  %v737_v25 = vmul.f32 %v2223_v14, %v2223_v14  ;;  %v2244_v29 = vpop.f32.mrb[11].mxu1 }
  0xf9   :  { %v797_v16 = vadd.f32 %v796_v13, %v734_v12  ;;  %v665_v17 = vadd.f32 %v664_v11, %v2225_v15  ;;  %v735_v18 = vmul.f32 %v2225_v15, %v2225_v15 }
  0xfb   :  { %v666_v21 = vadd.f32 %v2213_v7, %v665_v17  ;;  %v798_v22 = vadd.f32 %v797_v16, %v735_v18 }
  0xfd   :  { %v799_v26 = vadd.f32 %v798_v22, %v736_v20  ;;  %v2241_v27 = vpop.f32.mrb[12].mxu0  ;;  %v667_v28 = vadd.f32 %v2223_v14, %v666_v21  ;;  %v2258_v44 = vpop.f32.mrb[12].mxu1 }
  0xfe   :  { %v2246_v30 = vpop.f32.mrb[13].mxu0  ;;  %v740_v45 = vmul.f32 %v2241_v27, %v2241_v27  ;;  %v2263_v50 = vpop.f32.mrb[13].mxu1 }
  0xff   :  { %v668_v31 = vadd.f32 %v667_v28, %v2246_v30  ;;  %v738_v32 = vmul.f32 %v2246_v30, %v2246_v30  ;;  %v800_v33 = vadd.f32 %v799_v26, %v737_v25  ;;  %v2251_v34 = vpop.f32.mrb[14].mxu0  ;;  %v2265_v52 = vpop.f32.mrb[14].mxu1 }
 0x100   :  { %v2253_v35 = vpop.f32.mrb[15].mxu0  ;;  %v741_v55 = vmul.f32 %v2251_v34, %v2251_v34  ;;  %v2272_v61 = vpop.f32.mrb[15].mxu1 }
 0x101   :  { %v801_v40 = vadd.f32 %v800_v33, %v738_v32  ;;  %v669_v41 = vadd.f32 %v668_v31, %v2253_v35  ;;  %v739_v42 = vmul.f32 %v2253_v35, %v2253_v35 }
 0x103   :  { %v670_v46 = vadd.f32 %v2241_v27, %v669_v41  ;;  %v802_v49 = vadd.f32 %v801_v40, %v739_v42 }
 0x105   :  { %v803_v56 = vadd.f32 %v802_v49, %v740_v45  ;;  %v2269_v57 = vpop.f32.mrb[16].mxu0  ;;  %v671_v60 = vadd.f32 %v2251_v34, %v670_v46  ;;  %v2286_v13 = vpop.f32.mrb[16].mxu1 }
 0x106   :  { %3579 = vst [vmem:[#allocation2_spill] sm:$0xff] %v2269_v57  ;;  %v2274_v62 = vpop.f32.mrb[17].mxu0  ;;  %v744_v16 = vmul.f32 %v2269_v57, %v2269_v57  ;;  %v2291_v20 = vpop.f32.mrb[17].mxu1 }
 0x107   :  { %v672_v0 = vadd.f32 %v671_v60, %v2274_v62  ;;  %v742_v1 = vmul.f32 %v2274_v62, %v2274_v62  ;;  %v804_v2 = vadd.f32 %v803_v56, %v741_v55  ;;  %v2279_v5 = vpop.f32.mrb[18].mxu0  ;;  %v2293_v21 = vpop.f32.mrb[18].mxu1 }
 0x108   :  { %3580 = vst [vmem:[#allocation3_spill] sm:$0xff] %v2279_v5  ;;  %v2281_v6 = vpop.f32.mrb[19].mxu0  ;;  %v745_v22 = vmul.f32 %v2279_v5, %v2279_v5  ;;  %v2300_v31 = vpop.f32.mrb[19].mxu1 }
 0x109   :  { %3581 = vst [vmem:[#allocation4_spill] sm:$0xff] %v2281_v6  ;;  %v805_v8 = vadd.f32 %v804_v2, %v742_v1  ;;  %v673_v11 = vadd.f32 %v672_v0, %v2281_v6  ;;  %v743_v12 = vmul.f32 %v2281_v6, %v2281_v6 }
 0x10b   :  { %v674_v17 = vadd.f32 %v2269_v57, %v673_v11  ;;  %v806_v18 = vadd.f32 %v805_v8, %v743_v12 }
 0x10d   :  { %v807_v25 = vadd.f32 %v806_v18, %v744_v16  ;;  %v2297_v26 = vpop.f32.mrb[20].mxu0  ;;  %v675_v28 = vadd.f32 %v2279_v5, %v674_v17  ;;  %v2314_v56 = vpop.f32.mrb[20].mxu1 }
 0x10e   :  { %3582 = vst [vmem:[#allocation5_spill] sm:$0xff] %v2297_v26  ;;  %v2302_v32 = vpop.f32.mrb[21].mxu0  ;;  %3586 = vst [vmem:[#allocation9_spill] sm:$0xff] %v2314_v56  ;;  %v748_v60 = vmul.f32 %v2297_v26, %v2297_v26  ;;  %v2319_v2 = vpop.f32.mrb[21].mxu1 }
 0x10f   :  { %3583 = vst [vmem:[#allocation6_spill] sm:$0xff] %v2302_v32  ;;  %v676_v33 = vadd.f32 %v675_v28, %v2302_v32  ;;  %v746_v40 = vmul.f32 %v2302_v32, %v2302_v32  ;;  %v808_v41 = vadd.f32 %v807_v25, %v745_v22  ;;  %v2307_v42 = vpop.f32.mrb[22].mxu0  ;;  %v2321_v8 = vpop.f32.mrb[22].mxu1 }
 0x110   :  { %3584 = vst [vmem:[#allocation7_spill] sm:$0xff] %v2307_v42  ;;  %v2309_v45 = vpop.f32.mrb[23].mxu0  ;;  %3587 = vst [vmem:[#allocation10_spill] sm:$0xff] %v2321_v8  ;;  %v749_v11 = vmul.f32 %v2307_v42, %v2307_v42  ;;  %v2328_v18 = vpop.f32.mrb[23].mxu1 }
 0x111   :  { %3585 = vst [vmem:[#allocation8_spill] sm:$0xff] %v2309_v45  ;;  %v809_v46 = vadd.f32 %v808_v41, %v746_v40  ;;  %v677_v49 = vadd.f32 %v676_v33, %v2309_v45  ;;  %v747_v55 = vmul.f32 %v2309_v45, %v2309_v45 }
 0x113   :  { %v678_v0 = vadd.f32 %v2297_v26, %v677_v49  ;;  %v810_v1 = vadd.f32 %v809_v46, %v747_v55 }
 0x115   :  { %v811_v12 = vadd.f32 %v810_v1, %v748_v60  ;;  %v2325_v16 = vpop.f32.mrb[24].mxu0  ;;  %v679_v17 = vadd.f32 %v2307_v42, %v678_v0  ;;  %v2342_v60 = vpop.f32.mrb[24].mxu1 }
 0x116   :  { %3588 = vst [vmem:[#allocation11_spill] sm:$0xff] %v2325_v16  ;;  %v2330_v22 = vpop.f32.mrb[25].mxu0  ;;  %3592 = vst [vmem:[#allocation15_spill] sm:$0xff] %v2342_v60  ;;  %v752_v0 = vmul.f32 %v2325_v16, %v2325_v16 }
 0x117   :  { %3589 = vst [vmem:[#allocation12_spill] sm:$0xff] %v2330_v22  ;;  %v680_v25 = vadd.f32 %v679_v17, %v2330_v22  ;;  %v750_v28 = vmul.f32 %v2330_v22, %v2330_v22  ;;  %v812_v33 = vadd.f32 %v811_v12, %v749_v11  ;;  %v2335_v40 = vpop.f32.mrb[26].mxu0  ;;  %v2347_v22 = vpop.f32.mrb[25].mxu1 }
 0x118   :  { %3590 = vst [vmem:[#allocation13_spill] sm:$0xff] %v2335_v40  ;;  %v2337_v41 = vpop.f32.mrb[27].mxu0  ;;  %3593 = vst [vmem:[#allocation16_spill] sm:$0xff] %v2347_v22  ;;  %v2349_v11 = vpop.f32.mrb[26].mxu1  ;;  %v753_v12 = vmul.f32 %v2335_v40, %v2335_v40 }
 0x119   :  { %3591 = vst [vmem:[#allocation14_spill] sm:$0xff] %v2337_v41  ;;  %v813_v46 = vadd.f32 %v812_v33, %v750_v28  ;;  %v681_v49 = vadd.f32 %v680_v25, %v2337_v41  ;;  %v751_v55 = vmul.f32 %v2337_v41, %v2337_v41  ;;  %3594 = vst [vmem:[#allocation17_spill] sm:$0xff] %v2349_v11  ;;  %v2356_v41 = vpop.f32.mrb[27].mxu1 }
 0x11a   :  { %3596 = vst [vmem:[#allocation19_spill] sm:$0xff] %v2356_v41 }
 0x11b   :  { %v682_v1 = vadd.f32 %v2325_v16, %v681_v49  ;;  %v814_v17 = vadd.f32 %v813_v46, %v751_v55 }
 0x11d   :  { %v815_v28 = vadd.f32 %v814_v17, %v752_v0  ;;  %v2353_v25 = vpop.f32.mrb[28].mxu0  ;;  %v683_v33 = vadd.f32 %v2335_v40, %v682_v1  ;;  %v2370_v17 = vpop.f32.mrb[28].mxu1 }
 0x11e   :  { %3595 = vst [vmem:[#allocation18_spill] sm:$0xff] %v2353_v25  ;;  %v2358_v42 = vpop.f32.mrb[29].mxu0  ;;  %3600 = vst [vmem:[#allocation23_spill] sm:$0xff] %v2370_v17  ;;  %v756_v40 = vmul.f32 %v2353_v25, %v2353_v25 }
 0x11f   :  { %3597 = vst [vmem:[#allocation20_spill] sm:$0xff] %v2358_v42  ;;  %v684_v26 = vadd.f32 %v683_v33, %v2358_v42  ;;  %v754_v46 = vmul.f32 %v2358_v42, %v2358_v42  ;;  %v816_v49 = vadd.f32 %v815_v28, %v753_v12  ;;  %v2363_v55 = vpop.f32.mrb[30].mxu0  ;;  %v2375_v42 = vpop.f32.mrb[29].mxu1 }
 0x120   :  { %3598 = vst [vmem:[#allocation21_spill] sm:$0xff] %v2363_v55  ;;  %v2365_v16 = vpop.f32.mrb[31].mxu0  ;;  %3601 = vst [vmem:[#allocation24_spill] sm:$0xff] %v2375_v42  ;;  %v2377_v12 = vpop.f32.mrb[30].mxu1  ;;  %v757_v28 = vmul.f32 %v2363_v55, %v2363_v55 }
 0x121   :  { %3599 = vst [vmem:[#allocation22_spill] sm:$0xff] %v2365_v16  ;;  %v817_v45 = vadd.f32 %v816_v49, %v754_v46  ;;  %v685_v0 = vadd.f32 %v684_v26, %v2365_v16  ;;  %v755_v1 = vmul.f32 %v2365_v16, %v2365_v16  ;;  %v758_v49 = vmul.f32 %v2179_v47, %v2179_v47  ;;  %v2384_v16 = vpop.f32.mrb[31].mxu1 }
 0x122   :  { %3602 = vst [vmem:[#allocation25_spill] sm:$0xff] %v2384_v16 }
 0x123   :  { %v686_v33 = vadd.f32 %v2353_v25, %v685_v0  ;;  %v818_v32 = vadd.f32 %v817_v45, %v755_v1  ;;  %v759_v1 = vmul.f32 %v2188_v53, %v2188_v53  ;;  %v760_v25 = vmul.f32 %v2174_v43, %v2174_v43 }
 0x125   :  { %v819_v46 = vadd.f32 %v818_v32, %v756_v40  ;;  %v687_v26 = vadd.f32 %v2363_v55, %v686_v33  ;;  %v761_v33 = vmul.f32 %v2181_v48, %v2181_v48 }
 0x127   :  { %v688_v5 = vadd.f32 %v687_v26, %v2179_v47  ;;  %v820_v57 = vadd.f32 %v819_v46, %v757_v28 }
 0x129   :  { %v821_v0 = vadd.f32 %v820_v57, %v758_v49  ;;  %v689_v45 = vadd.f32 %v688_v5, %v2188_v53  ;;  %v762_v57 = vmul.f32 %v2207_v3, %v2207_v3  ;;  %v763_v49 = vmul.f32 %v2216_v9, %v2216_v9 }
 0x12b   :  { %v690_v32 = vadd.f32 %v2174_v43, %v689_v45  ;;  %v822_v40 = vadd.f32 %v821_v0, %v759_v1  ;;  %v764_v0 = vmul.f32 %v2202_v63, %v2202_v63  ;;  %v765_v1 = vmul.f32 %v2209_v4, %v2209_v4 }
 0x12d   :  { %v823_v55 = vadd.f32 %v822_v40, %v760_v25  ;;  %v691_v6 = vadd.f32 %v2181_v48, %v690_v32 }
 0x12f   :  { %v692_v5 = vadd.f32 %v691_v6, %v2207_v3  ;;  %v824_v28 = vadd.f32 %v823_v55, %v761_v33  ;;  %v766_v6 = vmul.f32 %v2235_v23, %v2235_v23 }
 0x131   :  { %v825_v46 = vadd.f32 %v824_v28, %v762_v57  ;;  %v693_v26 = vadd.f32 %v692_v5, %v2216_v9  ;;  %v767_v28 = vmul.f32 %v2244_v29, %v2244_v29 }
 0x133   :  { %v694_v45 = vadd.f32 %v2202_v63, %v693_v26  ;;  %v826_v25 = vadd.f32 %v825_v46, %v763_v49  ;;  %v768_v46 = vmul.f32 %v2230_v19, %v2230_v19 }
 0x135   :  { %v827_v32 = vadd.f32 %v826_v25, %v764_v0  ;;  %v695_v40 = vadd.f32 %v2209_v4, %v694_v45  ;;  %v769_v0 = vmul.f32 %v2237_v24, %v2237_v24 }
 0x137   :  { %v696_v55 = vadd.f32 %v695_v40, %v2235_v23  ;;  %v828_v33 = vadd.f32 %v827_v32, %v765_v1  ;;  %v770_v1 = vmul.f32 %v2263_v50, %v2263_v50 }
 0x139   :  { %v829_v57 = vadd.f32 %v828_v33, %v766_v6  ;;  %v697_v5 = vadd.f32 %v696_v55, %v2244_v29  ;;  %v771_v33 = vmul.f32 %v2272_v61, %v2272_v61 }
 0x13b   :  { %v698_v26 = vadd.f32 %v2230_v19, %v697_v5  ;;  %v830_v49 = vadd.f32 %v829_v57, %v767_v28  ;;  %v772_v57 = vmul.f32 %v2258_v44, %v2258_v44 }
 0x13d   :  { %v831_v45 = vadd.f32 %v830_v49, %v768_v46  ;;  %v699_v25 = vadd.f32 %v2237_v24, %v698_v26  ;;  %v773_v46 = vmul.f32 %v2265_v52, %v2265_v52 }
 0x13f   :  { %v700_v32 = vadd.f32 %v699_v25, %v2263_v50  ;;  %v832_v40 = vadd.f32 %v831_v45, %v769_v0  ;;  %v774_v0 = vmul.f32 %v2291_v20, %v2291_v20 }
 0x141   :  { %v833_v6 = vadd.f32 %v832_v40, %v770_v1  ;;  %v701_v55 = vadd.f32 %v700_v32, %v2272_v61  ;;  %v775_v40 = vmul.f32 %v2300_v31, %v2300_v31 }
 0x143   :  { %v702_v5 = vadd.f32 %v2258_v44, %v701_v55  ;;  %v834_v28 = vadd.f32 %v833_v6, %v771_v33  ;;  %v776_v6 = vmul.f32 %v2286_v13, %v2286_v13 }
 0x145   :  { %v835_v26 = vadd.f32 %v834_v28, %v772_v57  ;;  %v703_v49 = vadd.f32 %v2265_v52, %v702_v5  ;;  %v777_v57 = vmul.f32 %v2293_v21, %v2293_v21 }
 0x147   :  { %v704_v45 = vadd.f32 %v703_v49, %v2291_v20  ;;  %v836_v25 = vadd.f32 %v835_v26, %v773_v46  ;;  %v778_v46 = vmul.f32 %v2319_v2, %v2319_v2 }
 0x149   :  { %v837_v1 = vadd.f32 %v836_v25, %v774_v0  ;;  %v705_v32 = vadd.f32 %v704_v45, %v2300_v31  ;;  %v779_v25 = vmul.f32 %v2328_v18, %v2328_v18 }
 0x14b   :  { %v706_v55 = vadd.f32 %v2286_v13, %v705_v32  ;;  %v838_v33 = vadd.f32 %v837_v1, %v775_v40  ;;  %v780_v1 = vmul.f32 %v2314_v56, %v2314_v56 }
 0x14d   :  { %v839_v5 = vadd.f32 %v838_v33, %v776_v6  ;;  %v707_v28 = vadd.f32 %v2293_v21, %v706_v55  ;;  %v781_v6 = vmul.f32 %v2321_v8, %v2321_v8 }
 0x14f   :  { %v708_v26 = vadd.f32 %v707_v28, %v2319_v2  ;;  %v840_v49 = vadd.f32 %v839_v5, %v777_v57  ;;  %v782_v57 = vmul.f32 %v2347_v22, %v2347_v22 }
 0x151   :  { %v841_v0 = vadd.f32 %v840_v49, %v778_v46  ;;  %v709_v45 = vadd.f32 %v708_v26, %v2328_v18  ;;  %v783_v49 = vmul.f32 %v2356_v41, %v2356_v41 }
 0x153   :  { %v710_v32 = vadd.f32 %v2314_v56, %v709_v45  ;;  %v842_v40 = vadd.f32 %v841_v0, %v779_v25  ;;  %v784_v0 = vmul.f32 %v2342_v60, %v2342_v60 }
 0x155   :  { %v843_v55 = vadd.f32 %v842_v40, %v780_v1  ;;  %v711_v33 = vadd.f32 %v2321_v8, %v710_v32  ;;  %v785_v1 = vmul.f32 %v2349_v11, %v2349_v11 }
 0x157   :  { %v712_v5 = vadd.f32 %v711_v33, %v2347_v22  ;;  %v844_v28 = vadd.f32 %v843_v55, %v781_v6  ;;  %v786_v6 = vmul.f32 %v2375_v42, %v2375_v42 }
 0x159   :  { %v845_v46 = vadd.f32 %v844_v28, %v782_v57  ;;  %v713_v26 = vadd.f32 %v712_v5, %v2356_v41  ;;  %v787_v28 = vmul.f32 %v2384_v16, %v2384_v16 }
 0x15b   :  { %v714_v45 = vadd.f32 %v2342_v60, %v713_v26  ;;  %v846_v25 = vadd.f32 %v845_v46, %v783_v49  ;;  %v788_v46 = vmul.f32 %v2370_v17, %v2370_v17 }
 0x15d   :  { %v847_v32 = vadd.f32 %v846_v25, %v784_v0  ;;  %v715_v40 = vadd.f32 %v2349_v11, %v714_v45  ;;  %v789_v0 = vmul.f32 %v2377_v12, %v2377_v12 }
 0x15f   :  { %v716_v55 = vadd.f32 %v715_v40, %v2375_v42  ;;  %v848_v33 = vadd.f32 %v847_v32, %v785_v1 }
 0x161   :  { %v849_v57 = vadd.f32 %v848_v33, %v786_v6  ;;  %v717_v5 = vadd.f32 %v716_v55, %v2384_v16 }
 0x163   :  { %v718_v26 = vadd.f32 %v2370_v17, %v717_v5  ;;  %v850_v49 = vadd.f32 %v849_v57, %v787_v28 }
 0x165   :  { %v719_v45 = vadd.f32 %v2377_v12, %v718_v26  ;;  %v851_v25 = vadd.f32 %v850_v49, %v788_v46  ;;  %v871_v46 = vlaneseq }
 0x167   :  { %v720_v40 = vrot.slane %v719_v45, 4  ;;  %v852_v1 = vadd.f32 %v851_v25, %v789_v0  ;;  %v2480_v49 = vshrl.u32 %v871_v46, 7  ;;  %v866_v0 = vld [vmem:[%s3487_s2] sm:$0x1]  ;;  %v3610_v46 = vld [vmem:[#allocation12_spill] sm:$0xff] }
 0x169   :  { %v721_v32 = vadd.f32 %v720_v40, %v719_v45  ;;  %v853_v6 = vrot.slane %v852_v1, 4  ;;  %v3513_v45 = vsub.s32 0, %v2480_v49 }
 0x16b   :  { %v722_v55 = vrot.slane %v721_v32, 2  ;;  %v854_v33 = vadd.f32 %v853_v6, %v852_v1  ;;  %v3603_v1 = vld [vmem:[#allocation4_spill] sm:$0xff]  ;;  %v3605_v6 = vld [vmem:[#allocation3_spill] sm:$0xff] }
 0x16d   :  { %v723_v42 = vadd.f32 %v722_v55, %v721_v32  ;;  %v855_v16 = vrot.slane %v854_v33, 2  ;;  %v3604_v32 = vld [vmem:[#allocation2_spill] sm:$0xff] }
 0x16e   :  { %v3606_v55 = vld [vmem:[#allocation6_spill] sm:$0xff] }
 0x16f   :  { %v724_v11 = vrot.slane %v723_v42, 1  ;;  %v856_v60 = vadd.f32 %v855_v16, %v854_v33  ;;  %v3607_v33 = vld [vmem:[#allocation8_spill] sm:$0xff] }
 0x171   :  { %v725_v41 = vadd.f32 %v724_v11, %v723_v42  ;;  %v857_v22 = vrot.slane %v856_v60, 1 }
 0x173   :  { %v858_v5 = vadd.f32 %v857_v22, %v856_v60  ;;  %v859_v57 = vmul.f32 0.001953125, %v725_v41  ;;  %v2489_v22 = vld [vmem:[%s3487_s2 + $0x1] sm:$0x1] }
 0x175   :  { %v860_v28 = vmul.f32 0.001953125, %v858_v5  ;;  %v861_v17 = vmul.f32 %v859_v57, %v859_v57  ;;  %v3608_v5 = vld [vmem:[#allocation5_spill] sm:$0xff] }
 0x177   :  { %v862_v8 = vsub.f32 %v860_v28, %v861_v17  ;;  %v3609_v28 = vld [vmem:[#allocation7_spill] sm:$0xff] }
 0x179   :  { %v863_v56 = vmax.f32 %v862_v8, 0.0  ;;  %v3616_v8 = vld [vmem:[#allocation18_spill] sm:$0xff] }
 0x17b   :  { %v864_v26 = vadd.f32 1e-05, %v863_v56 }
 0x17d   :  { %1998 = vrsqrt.f32 %v864_v26 }
 0x187   :  { %v1999_v16 = vpop.eup %1998 }
 0x188   :  { %v868_v42 = vmul.f32 %v1999_v16, %v866_v0  ;;  %v3611_v16 = vld [vmem:[#allocation14_spill] sm:$0xff] }
 0x18a   :  { %v2491_v41 = vmul.f32 %v868_v42, %v859_v57  ;;  %v2495_v56 = vrot.slane %v868_v42, %v3513_v45  ;;  %v3617_v45 = vld [vmem:[#allocation21_spill] sm:$0xff] }
 0x18c   :  { %v2501_v60 = vmul.f32 %v2495_v56, %v2162_v37  ;;  %v2505_v11 = vmul.f32 %v2495_v56, %v2166_v39  ;;  %v2509_v17 = vmul.f32 %v2160_v36, %v2495_v56  ;;  %v2513_v25 = vmul.f32 %v2164_v38, %v2495_v56 }
 0x18d   :  { %v2517_v40 = vmul.f32 %v2495_v56, %v2190_v54  ;;  %v2521_v37 = vmul.f32 %v2495_v56, %v2197_v59  ;;  %v2525_v39 = vmul.f32 %v2185_v51, %v2495_v56  ;;  %v2529_v36 = vmul.f32 %v2195_v58, %v2495_v56 }
 0x18e   :  { %v2533_v38 = vmul.f32 %v2495_v56, %v2218_v10  ;;  %v2537_v54 = vmul.f32 %v2495_v56, %v2225_v15  ;;  %v2541_v59 = vmul.f32 %v2213_v7, %v2495_v56  ;;  %v2545_v51 = vmul.f32 %v2223_v14, %v2495_v56 }
 0x18f   :  { %v2549_v58 = vmul.f32 %v2495_v56, %v2246_v30  ;;  %v2553_v10 = vmul.f32 %v2495_v56, %v2253_v35  ;;  %v2557_v15 = vmul.f32 %v2241_v27, %v2495_v56  ;;  %v2561_v7 = vmul.f32 %v2251_v34, %v2495_v56 }
 0x190   :  { %v2565_v14 = vmul.f32 %v2495_v56, %v2274_v62  ;;  %v2569_v30 = vmul.f32 %v2495_v56, %v3603_v1  ;;  %v2573_v35 = vmul.f32 %v3604_v32, %v2495_v56  ;;  %v2577_v27 = vmul.f32 %v3605_v6, %v2495_v56  ;;  %v3612_v1 = vld [vmem:[#allocation11_spill] sm:$0xff]  ;;  %v3613_v6 = vld [vmem:[#allocation13_spill] sm:$0xff] }
 0x191   :  { %v2581_v34 = vmul.f32 %v2495_v56, %v3606_v55  ;;  %v2585_v62 = vmul.f32 %v2495_v56, %v3607_v33  ;;  %v2589_v57 = vmul.f32 %v3608_v5, %v2495_v56  ;;  %v2593_v26 = vmul.f32 %v3609_v28, %v2495_v56  ;;  %v3614_v33 = vld [vmem:[#allocation20_spill] sm:$0xff]  ;;  %v3615_v28 = vld [vmem:[#allocation22_spill] sm:$0xff] }
 0x192   :  { %v2597_v0 = vmul.f32 %v2495_v56, %v3610_v46  ;;  %v2601_v42 = vmul.f32 %v2495_v56, %v3611_v16  ;;  %v2605_v32 = vmul.f32 %v3612_v1, %v2495_v56  ;;  %v2609_v55 = vmul.f32 %v3613_v6, %v2495_v56 }
 0x193   :  { %v2613_v5 = vmul.f32 %v2495_v56, %v3614_v33  ;;  %v2617_v46 = vmul.f32 %v2495_v56, %v3615_v28  ;;  %v2621_v16 = vmul.f32 %v3616_v8, %v2495_v56  ;;  %v2625_v1 = vmul.f32 %v3617_v45, %v2495_v56 }
 0x194   :  { %v2629_v6 = vmul.f32 %v2495_v56, %v2179_v47  ;;  %v2633_v33 = vmul.f32 %v2495_v56, %v2188_v53  ;;  %v2637_v28 = vmul.f32 %v2174_v43, %v2495_v56  ;;  %v2641_v8 = vmul.f32 %v2181_v48, %v2495_v56 }
 0x195   :  { %v2645_v45 = vmul.f32 %v2495_v56, %v2207_v3  ;;  %v2649_v47 = vmul.f32 %v2495_v56, %v2216_v9  ;;  %v2653_v53 = vmul.f32 %v2202_v63, %v2495_v56  ;;  %v2657_v43 = vmul.f32 %v2209_v4, %v2495_v56 }
 0x196   :  { %v2661_v48 = vmul.f32 %v2495_v56, %v2235_v23  ;;  %v2665_v3 = vmul.f32 %v2495_v56, %v2244_v29  ;;  %v2669_v9 = vmul.f32 %v2230_v19, %v2495_v56  ;;  %v2673_v63 = vmul.f32 %v2237_v24, %v2495_v56 }
 0x197   :  { %v2677_v4 = vmul.f32 %v2495_v56, %v2263_v50  ;;  %v2681_v23 = vmul.f32 %v2495_v56, %v2272_v61  ;;  %v2685_v29 = vmul.f32 %v2258_v44, %v2495_v56  ;;  %v2689_v19 = vmul.f32 %v2265_v52, %v2495_v56 }
 0x198   :  { %v2693_v24 = vmul.f32 %v2495_v56, %v2291_v20  ;;  %v2697_v50 = vmul.f32 %v2495_v56, %v2300_v31  ;;  %v2701_v61 = vmul.f32 %v2286_v13, %v2495_v56  ;;  %v2705_v44 = vmul.f32 %v2293_v21, %v2495_v56 }
 0x199   :  { %v2709_v52 = vmul.f32 %v2495_v56, %v2319_v2  ;;  %v2713_v20 = vmul.f32 %v2495_v56, %v2328_v18 }
 0x19a   :  { %3618 = vst [vmem:[#allocation4_spill] sm:$0xff] %v2693_v24  ;;  %3619 = vst [vmem:[#allocation2_spill] sm:$0xff] %v2697_v50  ;;  %v3624_v24 = vld [vmem:[#allocation9_spill] sm:$0xff]  ;;  %v3626_v50 = vld [vmem:[#allocation10_spill] sm:$0xff] }
 0x19b   :  { %3620 = vst [vmem:[#allocation3_spill] sm:$0xff] %v2701_v61  ;;  %3621 = vst [vmem:[#allocation6_spill] sm:$0xff] %v2705_v44  ;;  %v2717_v31 = vmul.f32 %v3624_v24, %v2495_v56  ;;  %v2721_v13 = vmul.f32 %v3626_v50, %v2495_v56  ;;  %v3628_v61 = vld [vmem:[#allocation16_spill] sm:$0xff]  ;;  %v3630_v44 = vld [vmem:[#allocation19_spill] sm:$0xff] }
 0x19c   :  { %3622 = vst [vmem:[#allocation8_spill] sm:$0xff] %v2709_v52  ;;  %3623 = vst [vmem:[#allocation5_spill] sm:$0xff] %v2713_v20  ;;  %v2725_v21 = vmul.f32 %v2495_v56, %v3628_v61  ;;  %v2729_v2 = vmul.f32 %v2495_v56, %v3630_v44  ;;  %v3631_v52 = vld [vmem:[#allocation15_spill] sm:$0xff]  ;;  %v3633_v20 = vld [vmem:[#allocation17_spill] sm:$0xff] }
 0x19d   :  { %3625 = vst [vmem:[#allocation7_spill] sm:$0xff] %v2717_v31  ;;  %3627 = vst [vmem:[#allocation12_spill] sm:$0xff] %v2721_v13  ;;  %v2733_v18 = vmul.f32 %v3631_v52, %v2495_v56  ;;  %v2737_v24 = vmul.f32 %v3633_v20, %v2495_v56  ;;  %v3635_v31 = vld [vmem:[#allocation24_spill] sm:$0xff]  ;;  %v3636_v13 = vld [vmem:[#allocation25_spill] sm:$0xff]  ;;  %v2753_v52 = vmul.f32 %v2377_v12, %v2495_v56 }
 0x19e   :  { %3629 = vst [vmem:[#allocation14_spill] sm:$0xff] %v2725_v21  ;;  %v2741_v50 = vmul.f32 %v2495_v56, %v3635_v31  ;;  %v2745_v61 = vmul.f32 %v2495_v56, %v3636_v13  ;;  %v3637_v21 = vld [vmem:[#allocation23_spill] sm:$0xff]  ;;  %v3639_v20 = vsub.f32 %v2489_v22, %v2491_v41 }
 0x19f   :  { %3632 = vst [vmem:[#allocation11_spill] sm:$0xff] %v2733_v18  ;;  %3634 = vst [vmem:[#allocation13_spill] sm:$0xff] %v2737_v24  ;;  %v2749_v44 = vmul.f32 %v3637_v21, %v2495_v56  ;;  %v3638_v18 = vsub.s32 0, %v2480_v49 }
 0x1a1   :  { %v2760_v24 = vrot.slane %v3639_v20, %v3638_v18 }
 0x1a2   :  { %v3677_v18 = vld [vmem:[#allocation6_spill] sm:$0xff] }
 0x1a3   :  { %v2764_v31 = vadd.f32 %v2760_v24, %v2501_v60  ;;  %v2768_v13 = vadd.f32 %v2760_v24, %v2505_v11  ;;  %v2772_v21 = vadd.f32 %v2760_v24, %v2509_v17  ;;  %v2776_v12 = vadd.f32 %v2760_v24, %v2513_v25  ;;  %v3679_v20 = vld [vmem:[#allocation8_spill] sm:$0xff] }
 0x1a4   :  { %v2780_v49 = vadd.f32 %v2760_v24, %v2517_v40  ;;  %v2784_v22 = vadd.f32 %v2760_v24, %v2521_v37  ;;  %v2788_v41 = vadd.f32 %v2760_v24, %v2525_v39  ;;  %v2792_v56 = vadd.f32 %v2760_v24, %v2529_v36 }
 0x1a5   :  { %3640 = vst [vmem:[#allocation20_spill] sm:$0xff] %v2764_v31  ;;  %3641 = vst [vmem:[#allocation22_spill] sm:$0xff] %v2768_v13  ;;  %v2796_v60 = vadd.f32 %v2760_v24, %v2533_v38  ;;  %v2800_v11 = vadd.f32 %v2760_v24, %v2537_v54  ;;  %v2804_v17 = vadd.f32 %v2760_v24, %v2541_v59 }
 0x1a6   :  { %3642 = vst [vmem:[#allocation18_spill] sm:$0xff] %v2772_v21  ;;  %3643 = vst [vmem:[#allocation21_spill] sm:$0xff] %v2776_v12  ;;  %v2808_v25 = vadd.f32 %v2760_v24, %v2545_v51  ;;  %v2812_v40 = vadd.f32 %v2760_v24, %v2549_v58  ;;  %v2816_v37 = vadd.f32 %v2760_v24, %v2553_v10 }
 0x1a7   :  { %3644 = vst [vmem:[#allocation9_spill] sm:$0xff] %v2780_v49  ;;  %3645 = vst [vmem:[#allocation10_spill] sm:$0xff] %v2784_v22  ;;  %v2820_v39 = vadd.f32 %v2760_v24, %v2557_v15  ;;  %v2824_v36 = vadd.f32 %v2760_v24, %v2561_v7  ;;  %v2828_v38 = vadd.f32 %v2760_v24, %v2565_v14 }
 0x1a8   :  { %3646 = vst [vmem:[#allocation16_spill] sm:$0xff] %v2788_v41  ;;  %3647 = vst [vmem:[#allocation19_spill] sm:$0xff] %v2792_v56  ;;  %v2832_v54 = vadd.f32 %v2760_v24, %v2569_v30  ;;  %v2836_v59 = vadd.f32 %v2760_v24, %v2573_v35  ;;  %v2840_v51 = vadd.f32 %v2760_v24, %v2577_v27 }
 0x1a9   :  { %3648 = vst [vmem:[#allocation15_spill] sm:$0xff] %v2796_v60  ;;  %3649 = vst [vmem:[#allocation17_spill] sm:$0xff] %v2800_v11  ;;  %v2844_v58 = vadd.f32 %v2760_v24, %v2581_v34  ;;  %v2848_v10 = vadd.f32 %v2760_v24, %v2585_v62  ;;  %v2852_v15 = vadd.f32 %v2760_v24, %v2589_v57 }
 0x1aa   :  { %3650 = vst [vmem:[#allocation24_spill] sm:$0xff] %v2804_v17  ;;  %3651 = vst [vmem:[#allocation25_spill] sm:$0xff] %v2808_v25  ;;  %v2856_v7 = vadd.f32 %v2760_v24, %v2593_v26  ;;  %v2860_v14 = vadd.f32 %v2760_v24, %v2597_v0  ;;  %v2864_v30 = vadd.f32 %v2760_v24, %v2601_v42 }
 0x1ab   :  { %3652 = vst [vmem:[#allocation23_spill] sm:$0xff] %v2812_v40  ;;  %3653 = vst [vmem:[#allocation26_spill] sm:$0xff] %v2816_v37  ;;  %v2868_v35 = vadd.f32 %v2760_v24, %v2605_v32  ;;  %v2872_v27 = vadd.f32 %v2760_v24, %v2609_v55  ;;  %v2876_v34 = vadd.f32 %v2760_v24, %v2613_v5 }
 0x1ac   :  { %3654 = vst [vmem:[#allocation27_spill] sm:$0xff] %v2820_v39  ;;  %3655 = vst [vmem:[#allocation28_spill] sm:$0xff] %v2824_v36  ;;  %v2880_v62 = vadd.f32 %v2760_v24, %v2617_v46  ;;  %v2884_v57 = vadd.f32 %v2760_v24, %v2621_v16  ;;  %v2888_v26 = vadd.f32 %v2760_v24, %v2625_v1 }
 0x1ad   :  { %3656 = vst [vmem:[#allocation29_spill] sm:$0xff] %v2828_v38  ;;  %3657 = vst [vmem:[#allocation30_spill] sm:$0xff] %v2832_v54  ;;  %v2892_v0 = vadd.f32 %v2760_v24, %v2629_v6  ;;  %v2896_v42 = vadd.f32 %v2760_v24, %v2633_v33  ;;  %v2900_v32 = vadd.f32 %v2760_v24, %v2637_v28 }
 0x1ae   :  { %3658 = vst [vmem:[#allocation31_spill] sm:$0xff] %v2844_v58  ;;  %3659 = vst [vmem:[#allocation32_spill] sm:$0xff] %v2856_v7  ;;  %v2904_v55 = vadd.f32 %v2760_v24, %v2641_v8  ;;  %v2908_v5 = vadd.f32 %v2760_v24, %v2645_v45  ;;  %v2912_v46 = vadd.f32 %v2760_v24, %v2649_v47 }
 0x1af   :  { %3660 = vst [vmem:[#allocation33_spill] sm:$0xff] %v2868_v35  ;;  %3661 = vst [vmem:[#allocation34_spill] sm:$0xff] %v2880_v62  ;;  %v2916_v16 = vadd.f32 %v2760_v24, %v2653_v53  ;;  %v2920_v1 = vadd.f32 %v2760_v24, %v2657_v43  ;;  %v2924_v6 = vadd.f32 %v2760_v24, %v2661_v48  ;;  %v3671_v48 = vld [vmem:[#allocation4_spill] sm:$0xff] }
 0x1b0   :  { %3662 = vst [vmem:[#allocation35_spill] sm:$0xff] %v2892_v0  ;;  %3663 = vst [vmem:[#allocation36_spill] sm:$0xff] %v2904_v55  ;;  %v2928_v33 = vadd.f32 %v2760_v24, %v2665_v3  ;;  %v2932_v28 = vadd.f32 %v2760_v24, %v2669_v9  ;;  %v2936_v8 = vadd.f32 %v2760_v24, %v2673_v63  ;;  %v3673_v9 = vld [vmem:[#allocation2_spill] sm:$0xff] }
 0x1b1   :  { %3664 = vst [vmem:[#allocation37_spill] sm:$0xff] %v2916_v16  ;;  %v2940_v45 = vadd.f32 %v2760_v24, %v2677_v4  ;;  %v2944_v47 = vadd.f32 %v2760_v24, %v2681_v23  ;;  %v2948_v53 = vadd.f32 %v2760_v24, %v2685_v29  ;;  %v2952_v43 = vadd.f32 %v2760_v24, %v2689_v19  ;;  %v3675_v4 = vld [vmem:[#allocation3_spill] sm:$0xff] }
 0x1b2   :  { %3665 = vst [vmem:[#allocation38_spill] sm:$0xff] %v2928_v33  ;;  %3666 = vst [vmem:[#allocation39_spill] sm:$0xff] %v2936_v8  ;;  %v2956_v3 = vadd.f32 %v2760_v24, %v3671_v48  ;;  %v2960_v63 = vadd.f32 %v2760_v24, %v3673_v9  ;;  %v2964_v23 = vadd.f32 %v2760_v24, %v3675_v4 }
 0x1b3   :  { %3667 = vst [vmem:[#allocation40_spill] sm:$0xff] %v2940_v45  ;;  %3668 = vst [vmem:[#allocation41_spill] sm:$0xff] %v2944_v47  ;;  %v2968_v29 = vadd.f32 %v2760_v24, %v3677_v18  ;;  %v2972_v19 = vadd.f32 %v2760_v24, %v3679_v20  ;;  %v2992_v20 = vadd.f32 %v2760_v24, %v2729_v2 }
 0x1b4   :  { %3669 = vst [vmem:[#allocation42_spill] sm:$0xff] %v2948_v53  ;;  %3670 = vst [vmem:[#allocation43_spill] sm:$0xff] %v2952_v43  ;;  %v3681_v43 = vld [vmem:[#allocation5_spill] sm:$0xff]  ;;  %v3012_v2 = vadd.f32 %v2760_v24, %v2749_v44  ;;  %v3034_v44 = vmul.f32 0.2, %v2784_v22 }
 0x1b5   :  { %3672 = vst [vmem:[#allocation4_spill] sm:$0xff] %v2956_v3  ;;  %3674 = vst [vmem:[#allocation2_spill] sm:$0xff] %v2960_v63  ;;  %v2976_v48 = vadd.f32 %v2760_v24, %v3681_v43  ;;  %v3683_v3 = vld [vmem:[#allocation7_spill] sm:$0xff]  ;;  %v3685_v63 = vld [vmem:[#allocation12_spill] sm:$0xff]  ;;  %v3125_v22 = vmul.f32 0.2, %v2884_v57 }
 0x1b6   :  { %3676 = vst [vmem:[#allocation3_spill] sm:$0xff] %v2964_v23  ;;  %3678 = vst [vmem:[#allocation6_spill] sm:$0xff] %v2968_v29  ;;  %v2980_v9 = vadd.f32 %v2760_v24, %v3683_v3  ;;  %v2984_v4 = vadd.f32 %v2760_v24, %v3685_v63  ;;  %v3687_v23 = vld [vmem:[#allocation14_spill] sm:$0xff]  ;;  %v3004_v63 = vadd.f32 %v2760_v24, %v2741_v50  ;;  %v3025_v50 = vmul.f32 0.2, %v2772_v21 }
 0x1b7   :  { %3680 = vst [vmem:[#allocation8_spill] sm:$0xff] %v2972_v19  ;;  %3682 = vst [vmem:[#allocation5_spill] sm:$0xff] %v2976_v48  ;;  %v2988_v18 = vadd.f32 %v2760_v24, %v3687_v23  ;;  %v3690_v19 = vld [vmem:[#allocation11_spill] sm:$0xff]  ;;  %v3692_v48 = vld [vmem:[#allocation13_spill] sm:$0xff]  ;;  %v3008_v23 = vadd.f32 %v2760_v24, %v2745_v61  ;;  %v3028_v61 = vmul.f32 0.2, %v2776_v12 }
 0x1b8   :  { %3684 = vst [vmem:[#allocation7_spill] sm:$0xff] %v2980_v9  ;;  %3686 = vst [vmem:[#allocation12_spill] sm:$0xff] %v2984_v4  ;;  %v2996_v43 = vadd.f32 %v2760_v24, %v3690_v19  ;;  %v3000_v3 = vadd.f32 %v2760_v24, %v3692_v48  ;;  %v3016_v19 = vadd.f32 %v2760_v24, %v2753_v52  ;;  %v3022_v48 = vmul.f32 0.2, %v2768_v13 }
 0x1b9   :  { %3688 = vst [vmem:[#allocation14_spill] sm:$0xff] %v2988_v18  ;;  %3689 = vst [vmem:[#allocation44_spill] sm:$0xff] %v2992_v20  ;;  %v3037_v24 = vmul.f32 0.2, %v2788_v41  ;;  %v3040_v52 = vmul.f32 0.2, %v2792_v56 }
 0x1ba   :  { %3691 = vst [vmem:[#allocation11_spill] sm:$0xff] %v2996_v43  ;;  %3693 = vst [vmem:[#allocation13_spill] sm:$0xff] %v3000_v3  ;;  %v3019_v43 = vmul.f32 0.2, %v2764_v31  ;;  %v3051_v3 = vmul.f32 0.2, %v2804_v17 }
 0x1bb   :  { %3694 = vst [vmem:[#allocation45_spill] sm:$0xff] %v3004_v63  ;;  %3695 = vst [vmem:[#allocation46_spill] sm:$0xff] %v3008_v23  ;;  %v3031_v23 = vmul.f32 0.2, %v2780_v49  ;;  %v3048_v63 = vmul.f32 0.2, %v2800_v11 }
 0x1bc   :  { %3696 = vst [vmem:[#allocation47_spill] sm:$0xff] %v3012_v2  ;;  %3697 = vst [vmem:[#allocation48_spill] sm:$0xff] %v3016_v19  ;;  %v3043_v19 = vmul.f32 0.2, %v2796_v60  ;;  %v3054_v20 = vmul.f32 0.2, %v2808_v25 }
 0x1bd   :  { %3698 = vst [vmem:[#allocation49_spill] sm:$0xff] %v3019_v43  ;;  %3699 = vst [vmem:[#allocation50_spill] sm:$0xff] %v3022_v48  ;;  %v3059_v4 = vmul.f32 0.2, %v2812_v40  ;;  %v3062_v9 = vmul.f32 0.2, %v2816_v37 }
 0x1be   :  { %3700 = vst [vmem:[#allocation51_spill] sm:$0xff] %v3025_v50  ;;  %3701 = vst [vmem:[#allocation52_spill] sm:$0xff] %v3028_v61  ;;  %v3065_v2 = vmul.f32 0.2, %v2820_v39  ;;  %v3070_v31 = vmul.f32 0.2, %v2824_v36 }
 0x1bf   :  { %3702 = vst [vmem:[#allocation53_spill] sm:$0xff] %v3031_v23  ;;  %3703 = vst [vmem:[#allocation54_spill] sm:$0xff] %v3034_v44  ;;  %v3073_v29 = vmul.f32 0.2, %v2828_v38  ;;  %v3076_v18 = vmul.f32 0.2, %v2832_v54 }
 0x1c0   :  { %3704 = vst [vmem:[#allocation55_spill] sm:$0xff] %v3037_v24  ;;  %3705 = vst [vmem:[#allocation56_spill] sm:$0xff] %v3040_v52  ;;  %v3081_v13 = vmul.f32 0.2, %v2836_v59  ;;  %v3084_v39 = vmul.f32 0.2, %v2840_v51 }
 0x1c1   :  { %3706 = vst [vmem:[#allocation57_spill] sm:$0xff] %v3043_v19  ;;  %3707 = vst [vmem:[#allocation58_spill] sm:$0xff] %v3048_v63  ;;  %v3087_v43 = vmul.f32 0.2, %v2844_v58  ;;  %v3092_v21 = vmul.f32 0.2, %v2848_v10 }
 0x1c2   :  { %3708 = vst [vmem:[#allocation59_spill] sm:$0xff] %v3051_v3  ;;  %3709 = vst [vmem:[#allocation60_spill] sm:$0xff] %v3054_v20  ;;  %v3095_v54 = vmul.f32 0.2, %v2852_v15  ;;  %v3098_v48 = vmul.f32 0.2, %v2856_v7 }
 0x1c3   :  { %3710 = vst [vmem:[#allocation61_spill] sm:$0xff] %v3059_v4  ;;  %3711 = vst [vmem:[#allocation62_spill] sm:$0xff] %v3062_v9  ;;  %v3103_v12 = vmul.f32 0.2, %v2860_v14  ;;  %v3106_v58 = vmul.f32 0.2, %v2864_v30 }
 0x1c4   :  { %3712 = vst [vmem:[#allocation63_spill] sm:$0xff] %v3065_v2  ;;  %3713 = vst [vmem:[#allocation64_spill] sm:$0xff] %v3070_v31  ;;  %v3109_v50 = vmul.f32 0.2, %v2868_v35  ;;  %v3114_v49 = vmul.f32 0.2, %v2872_v27 }
 0x1c5   :  { %3714 = vst [vmem:[#allocation65_spill] sm:$0xff] %v3073_v29  ;;  %v3117_v7 = vmul.f32 0.2, %v2876_v34  ;;  %v3120_v61 = vmul.f32 0.2, %v2880_v62  ;;  %v3721_v25 = vld [vmem:[#allocation4_spill] sm:$0xff]  ;;  %v1089_v29 = vmax.f32 %v2836_v59, %v3081_v13  ;;  %v1095_v13 = vmax.f32 %v2860_v14, %v3103_v12 }
 0x1c6   :  { %v3128_v35 = vmul.f32 0.2, %v2888_v26  ;;  %v3131_v23 = vmul.f32 0.2, %v2892_v0  ;;  %v3136_v41 = vmul.f32 0.2, %v2896_v42  ;;  %v1096_v59 = vmax.f32 %v2864_v30, %v3106_v58 }
 0x1c7   :  { %v3139_v62 = vmul.f32 0.2, %v2900_v32  ;;  %v3142_v44 = vmul.f32 0.2, %v2904_v55  ;;  %v3147_v56 = vmul.f32 0.2, %v2908_v5 }
 0x1c8   :  { %v3150_v0 = vmul.f32 0.2, %v2912_v46  ;;  %v3153_v24 = vmul.f32 0.2, %v2916_v16  ;;  %v3158_v60 = vmul.f32 0.2, %v2920_v1  ;;  %v1102_v12 = vmax.f32 %v2888_v26, %v3128_v35 }
 0x1c9   :  { %v3161_v55 = vmul.f32 0.2, %v2924_v6  ;;  %v3164_v52 = vmul.f32 0.2, %v2928_v33  ;;  %v3169_v11 = vmul.f32 0.2, %v2932_v28  ;;  %v1104_v14 = vmax.f32 %v2896_v42, %v3136_v41 }
 0x1ca   :  { %v3172_v16 = vmul.f32 0.2, %v2936_v8  ;;  %v3175_v19 = vmul.f32 0.2, %v2940_v45  ;;  %v3180_v17 = vmul.f32 0.2, %v2944_v47 }
 0x1cb   :  { %3715 = vst [vmem:[#allocation66_spill] sm:$0xff] %v3164_v52  ;;  %v3183_v33 = vmul.f32 0.2, %v2948_v53  ;;  %v3719_v52 = vld [vmem:[#allocation43_spill] sm:$0xff]  ;;  %v3191_v8 = vmul.f32 0.2, %v3721_v25  ;;  %v1111_v41 = vmax.f32 %v2924_v6, %v3161_v55 }
 0x1cc   :  { %3716 = vst [vmem:[#allocation67_spill] sm:$0xff] %v3172_v16  ;;  %3717 = vst [vmem:[#allocation68_spill] sm:$0xff] %v3175_v19  ;;  %v3186_v63 = vmul.f32 0.2, %v3719_v52  ;;  %v3722_v45 = vld [vmem:[#allocation2_spill] sm:$0xff]  ;;  %v3724_v16 = vld [vmem:[#allocation3_spill] sm:$0xff] }
 0x1cd   :  { %3718 = vst [vmem:[#allocation69_spill] sm:$0xff] %v3183_v33  ;;  %v3194_v19 = vmul.f32 0.2, %v3722_v45  ;;  %v3197_v3 = vmul.f32 0.2, %v3724_v16  ;;  %v3727_v53 = vld [vmem:[#allocation6_spill] sm:$0xff] }
 0x1ce   :  { %3720 = vst [vmem:[#allocation70_spill] sm:$0xff] %v3186_v63  ;;  %v3202_v33 = vmul.f32 0.2, %v3727_v53  ;;  %v3728_v52 = vld [vmem:[#allocation8_spill] sm:$0xff]  ;;  %v3730_v47 = vld [vmem:[#allocation5_spill] sm:$0xff]  ;;  %v3732_v37 = vld [vmem:[#allocation7_spill] sm:$0xff] }
 0x1cf   :  { %3723 = vst [vmem:[#allocation4_spill] sm:$0xff] %v3194_v19  ;;  %3725 = vst [vmem:[#allocation71_spill] sm:$0xff] %v3197_v3  ;;  %v3205_v63 = vmul.f32 0.2, %v3728_v52  ;;  %v3208_v20 = vmul.f32 0.2, %v3730_v47 }
 0x1d0   :  { %v3213_v45 = vmul.f32 0.2, %v3732_v37  ;;  %v3733_v16 = vld [vmem:[#allocation12_spill] sm:$0xff]  ;;  %v3735_v19 = vld [vmem:[#allocation14_spill] sm:$0xff]  ;;  %v3738_v47 = vld [vmem:[#allocation11_spill] sm:$0xff] }
 0x1d1   :  { %3729 = vst [vmem:[#allocation6_spill] sm:$0xff] %v3205_v63  ;;  %3731 = vst [vmem:[#allocation72_spill] sm:$0xff] %v3208_v20  ;;  %v3216_v3 = vmul.f32 0.2, %v3733_v16  ;;  %v3219_v40 = vmul.f32 0.2, %v3735_v19 }
 0x1d2   :  { %v3737_v4 = vld [vmem:[#allocation44_spill] sm:$0xff]  ;;  %v3227_v20 = vmul.f32 0.2, %v3738_v47  ;;  %v3739_v63 = vld [vmem:[#allocation13_spill] sm:$0xff]  ;;  %v3740_v31 = vld [vmem:[#allocation30_spill] sm:$0xff] }
 0x1d3   :  { %3734 = vst [vmem:[#allocation73_spill] sm:$0xff] %v3216_v3  ;;  %3736 = vst [vmem:[#allocation74_spill] sm:$0xff] %v3219_v40  ;;  %v3224_v52 = vmul.f32 0.2, %v3737_v4  ;;  %v3230_v9 = vmul.f32 0.2, %v3739_v63  ;;  %v1088_v36 = vmax.f32 %v3740_v31, %v3076_v18  ;;  %v1090_v63 = vmax.f32 %v2840_v51, %v3084_v39 }
 0x1d4   :  { %v3741_v16 = vld [vmem:[#allocation45_spill] sm:$0xff]  ;;  %v3742_v19 = vld [vmem:[#allocation46_spill] sm:$0xff]  ;;  %v3743_v37 = vld [vmem:[#allocation47_spill] sm:$0xff] }
 0x1d5   :  { %v3235_v3 = vmul.f32 0.2, %v3741_v16  ;;  %v3238_v40 = vmul.f32 0.2, %v3742_v19  ;;  %v3241_v2 = vmul.f32 0.2, %v3743_v37  ;;  %v1092_v16 = vmax.f32 %v2848_v10, %v3092_v21 }
 0x1d6   :  { %v3745_v38 = vld [vmem:[#allocation48_spill] sm:$0xff]  ;;  %v3746_v31 = vld [vmem:[#allocation31_spill] sm:$0xff]  ;;  %v1093_v19 = vmax.f32 %v2852_v15, %v3095_v54  ;;  %v3748_v39 = vld [vmem:[#allocation33_spill] sm:$0xff]  ;;  %v1099_v21 = vmax.f32 %v2876_v34, %v3117_v7 }
 0x1d7   :  { %3744 = vst [vmem:[#allocation44_spill] sm:$0xff] %v3241_v2  ;;  %v3246_v47 = vmul.f32 0.2, %v3745_v38  ;;  %v1091_v18 = vmax.f32 %v3746_v31, %v3087_v43  ;;  %v3747_v37 = vld [vmem:[#allocation32_spill] sm:$0xff]  ;;  %v1097_v51 = vmax.f32 %v3748_v39, %v3109_v50  ;;  %v1098_v43 = vmax.f32 %v2872_v27, %v3114_v49  ;;  %v3749_v54 = vld [vmem:[#allocation34_spill] sm:$0xff]  ;;  %v3750_v58 = vld [vmem:[#allocation35_spill] sm:$0xff] }
 0x1d8   :  { %v1094_v2 = vmax.f32 %v3747_v37, %v3098_v48  ;;  %v1100_v10 = vmax.f32 %v3749_v54, %v3120_v61  ;;  %v1101_v37 = vmax.f32 %v2884_v57, %v3125_v22  ;;  %v1103_v15 = vmax.f32 %v3750_v58, %v3131_v23  ;;  %v3751_v7 = vld [vmem:[#allocation36_spill] sm:$0xff]  ;;  %v3752_v35 = vld [vmem:[#allocation37_spill] sm:$0xff]  ;;  %v3753_v26 = vld [vmem:[#allocation66_spill] sm:$0xff] }
 0x1d9   :  { %v1105_v49 = vmax.f32 %v2900_v32, %v3139_v62  ;;  %v1106_v30 = vmax.f32 %v3751_v7, %v3142_v44  ;;  %v1107_v27 = vmax.f32 %v2908_v5, %v3147_v56  ;;  %v1108_v22 = vmax.f32 %v2912_v46, %v3150_v0  ;;  %v3754_v62 = vld [vmem:[#allocation38_spill] sm:$0xff]  ;;  %v3755_v23 = vld [vmem:[#allocation67_spill] sm:$0xff]  ;;  %v3757_v48 = vld [vmem:[#allocation68_spill] sm:$0xff] }
 0x1da   :  { %v1109_v34 = vmax.f32 %v3752_v35, %v3153_v24  ;;  %v1110_v57 = vmax.f32 %v2920_v1, %v3158_v60  ;;  %v1112_v42 = vmax.f32 %v3754_v62, %v3753_v26  ;;  %v1113_v32 = vmax.f32 %v2932_v28, %v3169_v11  ;;  %v3756_v56 = vld [vmem:[#allocation39_spill] sm:$0xff]  ;;  %v3758_v0 = vld [vmem:[#allocation40_spill] sm:$0xff]  ;;  %v3759_v50 = vld [vmem:[#allocation41_spill] sm:$0xff] }
 0x1db   :  { %v1114_v5 = vmax.f32 %v3756_v56, %v3755_v23  ;;  %v1115_v46 = vmax.f32 %v3758_v0, %v3757_v48  ;;  %v1116_v61 = vmax.f32 %v3759_v50, %v3180_v17  ;;  %v3760_v44 = vld [vmem:[#allocation69_spill] sm:$0xff]  ;;  %v3761_v60 = vld [vmem:[#allocation42_spill] sm:$0xff]  ;;  %v3763_v55 = vld [vmem:[#allocation43_spill] sm:$0xff]  ;;  %v1119_v31 = vmax.f32 %v3721_v25, %v3191_v8 }
 0x1dc   :  { %v1117_v1 = vmax.f32 %v3761_v60, %v3760_v44  ;;  %v3762_v24 = vld [vmem:[#allocation70_spill] sm:$0xff]  ;;  %v3764_v39 = vld [vmem:[#allocation4_spill] sm:$0xff]  ;;  %v3766_v54 = vld [vmem:[#allocation71_spill] sm:$0xff]  ;;  %v1122_v35 = vmax.f32 %v3727_v53, %v3202_v33 }
 0x1dd   :  { %v1118_v6 = vmax.f32 %v3763_v55, %v3762_v24  ;;  %v3765_v11 = vld [vmem:[#allocation2_spill] sm:$0xff]  ;;  %v3767_v58 = vld [vmem:[#allocation3_spill] sm:$0xff]  ;;  %v3769_v17 = vld [vmem:[#allocation8_spill] sm:$0xff] }
 0x1de   :  { %v1120_v28 = vmax.f32 %v3765_v11, %v3764_v39  ;;  %v1121_v7 = vmax.f32 %v3767_v58, %v3766_v54  ;;  %v3768_v26 = vld [vmem:[#allocation6_spill] sm:$0xff]  ;;  %v3770_v23 = vld [vmem:[#allocation72_spill] sm:$0xff]  ;;  %v3771_v56 = vld [vmem:[#allocation5_spill] sm:$0xff]  ;;  %v1128_v39 = vmax.f32 %v3737_v4, %v3224_v52 }
 0x1df   :  { %v1123_v62 = vmax.f32 %v3769_v17, %v3768_v26  ;;  %v1124_v48 = vmax.f32 %v3771_v56, %v3770_v23  ;;  %v3772_v0 = vld [vmem:[#allocation7_spill] sm:$0xff]  ;;  %v3773_v44 = vld [vmem:[#allocation73_spill] sm:$0xff]  ;;  %v3774_v25 = vld [vmem:[#allocation12_spill] sm:$0xff] }
 0x1e0   :  { %v1125_v50 = vmax.f32 %v3772_v0, %v3213_v45  ;;  %v1126_v8 = vmax.f32 %v3774_v25, %v3773_v44  ;;  %v3775_v60 = vld [vmem:[#allocation74_spill] sm:$0xff]  ;;  %v3777_v33 = vld [vmem:[#allocation11_spill] sm:$0xff]  ;;  %v3778_v11 = vld [vmem:[#allocation13_spill] sm:$0xff]  ;;  %v1134_v44 = vmax.f32 %v3745_v38, %v3246_v47 }
 0x1e1   :  { %v3776_v24 = vld [vmem:[#allocation14_spill] sm:$0xff]  ;;  %v1129_v53 = vmax.f32 %v3777_v33, %v3227_v20  ;;  %v1130_v54 = vmax.f32 %v3778_v11, %v3230_v9  ;;  %v3779_v58 = vld [vmem:[#allocation45_spill] sm:$0xff]  ;;  %v3781_v23 = vld [vmem:[#allocation44_spill] sm:$0xff] }
 0x1e2   :  { %v1127_v55 = vmax.f32 %v3776_v24, %v3775_v60  ;;  %v1131_v26 = vmax.f32 %v3779_v58, %v3235_v3  ;;  %v3780_v45 = vld [vmem:[#allocation46_spill] sm:$0xff]  ;;  %v3782_v56 = vld [vmem:[#allocation47_spill] sm:$0xff]  ;;  %v3783_v25 = vld [vmem:[#allocation20_spill] sm:$0xff] }
 0x1e3   :  { %v1132_v17 = vmax.f32 %v3780_v45, %v3238_v40  ;;  %v1133_v0 = vmax.f32 %v3782_v56, %v3781_v23  ;;  %v3784_v4 = vld [vmem:[#allocation49_spill] sm:$0xff]  ;;  %v3786_v60 = vld [vmem:[#allocation22_spill] sm:$0xff]  ;;  %v3790_v11 = vld [vmem:[#allocation51_spill] sm:$0xff] }
 0x1e4   :  { %v3785_v52 = vmax.f32 %v3783_v25, %v3784_v4  ;;  %v3787_v20 = vld [vmem:[#allocation50_spill] sm:$0xff]  ;;  %v3792_v58 = vld [vmem:[#allocation21_spill] sm:$0xff]  ;;  %v3793_v40 = vld [vmem:[#allocation52_spill] sm:$0xff] }
 0x1e5   :  { %v3788_v24 = vmax.f32 %v3786_v60, %v3787_v20  ;;  %v3789_v9 = vld [vmem:[#allocation18_spill] sm:$0xff]  ;;  %v3794_v45 = vmax.f32 %v3792_v58, %v3793_v40  ;;  %v3795_v56 = vld [vmem:[#allocation9_spill] sm:$0xff]  ;;  %v3805_v40 = vld [vmem:[#allocation56_spill] sm:$0xff] }
 0x1e6   :  { %v3791_v3 = vmax.f32 %v3789_v9, %v3790_v11  ;;  %v3796_v38 = vld [vmem:[#allocation53_spill] sm:$0xff]  ;;  %v3798_v4 = vld [vmem:[#allocation10_spill] sm:$0xff]  ;;  %v3804_v11 = vld [vmem:[#allocation19_spill] sm:$0xff] }
 0x1e7   :  { %v1658_v33 = vpack.c.bf16 %v3788_v24, %v3785_v52  ;;  %v3797_v47 = vmax.f32 %v3795_v56, %v3796_v38  ;;  %v3799_v25 = vld [vmem:[#allocation54_spill] sm:$0xff]  ;;  %v3801_v24 = vld [vmem:[#allocation16_spill] sm:$0xff]  ;;  %v3802_v52 = vld [vmem:[#allocation55_spill] sm:$0xff]  ;;  %v3806_v58 = vmax.f32 %v3804_v11, %v3805_v40 }
 0x1e8   :  { %v1663_v23 = vpack.c.bf16 %v3794_v45, %v3791_v3  ;;  %v3800_v20 = vmax.f32 %v3798_v4, %v3799_v25  ;;  %v3803_v9 = vmax.f32 %v3801_v24, %v3802_v52  ;;  %v3807_v45 = vld [vmem:[#allocation15_spill] sm:$0xff]  ;;  %v3808_v38 = vld [vmem:[#allocation57_spill] sm:$0xff]  ;;  %v3811_v25 = vld [vmem:[#allocation58_spill] sm:$0xff] }
 0x1e9   :  { %v3809_v56 = vmax.f32 %v3807_v45, %v3808_v38  ;;  %v3810_v4 = vld [vmem:[#allocation17_spill] sm:$0xff]  ;;  %v3813_v24 = vld [vmem:[#allocation24_spill] sm:$0xff]  ;;  %v3814_v52 = vld [vmem:[#allocation59_spill] sm:$0xff]  ;;  %1659 = vst [vmem:[%s3488_s3] sm:$0xff] %v1658_v33  }
 0x1ea   :  { %v1668_v60 = vpack.c.bf16 %v3800_v20, %v3797_v47  ;;  %v1673_v3 = vpack.c.bf16 %v3806_v58, %v3803_v9  ;;  %v3812_v20 = vmax.f32 %v3810_v4, %v3811_v25  ;;  %v3815_v11 = vmax.f32 %v3813_v24, %v3814_v52  ;;  %v3816_v40 = vld [vmem:[#allocation25_spill] sm:$0xff]  ;;  %v3817_v9 = vld [vmem:[#allocation60_spill] sm:$0xff]  ;;  %1815 = vst [vmem:[%s3488_s3 + $0x8] sm:$0xff] %v1663_v23   ;;  %v3819_v45 = vld [vmem:[#allocation23_spill] sm:$0xff] }
 0x1eb   :  { %v3818_v58 = vmax.f32 %v3816_v40, %v3817_v9  ;;  %v3820_v4 = vld [vmem:[#allocation61_spill] sm:$0xff]  ;;  %v3825_v9 = vld [vmem:[#allocation27_spill] sm:$0xff]  ;;  %v3829_v33 = vld [vmem:[#allocation64_spill] sm:$0xff] }
 0x1ec   :  { %v1678_v47 = vpack.c.bf16 %v3812_v20, %v3809_v56  ;;  %v3821_v25 = vmax.f32 %v3819_v45, %v3820_v4  ;;  %v3822_v20 = vld [vmem:[#allocation26_spill] sm:$0xff]  ;;  %v3826_v40 = vld [vmem:[#allocation63_spill] sm:$0xff]  ;;  %v3831_v45 = vld [vmem:[#allocation29_spill] sm:$0xff]  ;;  %1816 = vst [vmem:[%s3488_s3 + $0x10] sm:$0xff] %v1668_v60  }
 0x1ed   :  { %v1683_v38 = vpack.c.bf16 %v3818_v58, %v3815_v11  ;;  %v3823_v56 = vld [vmem:[#allocation62_spill] sm:$0xff]  ;;  %v3827_v11 = vmax.f32 %v3825_v9, %v3826_v40  ;;  %v3828_v58 = vld [vmem:[#allocation28_spill] sm:$0xff]  ;;  %1817 = vst [vmem:[%s3488_s3 + $0x18] sm:$0xff] %v1673_v3   ;;  %v1708_v9 = vpack.c.bf16 %v1092_v16, %v1091_v18  ;;  %v1713_v40 = vpack.c.bf16 %v1094_v2, %v1093_v19 }
 0x1ee   :  { %v3824_v24 = vmax.f32 %v3822_v20, %v3823_v56  ;;  %v3830_v23 = vmax.f32 %v3828_v58, %v3829_v33  ;;  %v3832_v20 = vld [vmem:[#allocation65_spill] sm:$0xff]  ;;  %1818 = vst [vmem:[%s3488_s3 + $0x20] sm:$0xff] %v1678_v47   ;;  %v1728_v16 = vpack.c.bf16 %v1100_v10, %v1099_v21  ;;  %v1738_v2 = vpack.c.bf16 %v1104_v14, %v1103_v15 }
 0x1ef   :  { %v3833_v56 = vmax.f32 %v3831_v45, %v3832_v20  ;;  %1819 = vst [vmem:[%s3488_s3 + $0x28] sm:$0xff] %v1683_v38   ;;  %v1743_v19 = vpack.c.bf16 %v1106_v30, %v1105_v49  ;;  %1824 = vst [vmem:[%s3488_s3 + $0x50] sm:$0xff] %v1708_v9   ;;  %v1748_v18 = vpack.c.bf16 %v1108_v22, %v1107_v27 }
 0x1f0   :  { %v1688_v52 = vpack.c.bf16 %v3824_v24, %v3821_v25  ;;  %v1693_v4 = vpack.c.bf16 %v3830_v23, %v3827_v11  ;;  %v1703_v25 = vpack.c.bf16 %v1090_v63, %v1089_v29  ;;  %v1723_v29 = vpack.c.bf16 %v1098_v43, %v1097_v51  ;;  %1825 = vst [vmem:[%s3488_s3 + $0x58] sm:$0xff] %v1713_v40  }
 0x1f1   :  { %v1698_v24 = vpack.c.bf16 %v1088_v36, %v3833_v56  ;;  %v1718_v36 = vpack.c.bf16 %v1096_v59, %v1095_v13  ;;  %v1733_v63 = vpack.c.bf16 %v1102_v12, %v1101_v37  ;;  %v1753_v13 = vpack.c.bf16 %v1110_v57, %v1109_v34  ;;  %1828 = vst [vmem:[%s3488_s3 + $0x70] sm:$0xff] %v1728_v16  }
 0x1f2   :  { %1820 = vst [vmem:[%s3488_s3 + $0x30] sm:$0xff] %v1688_v52   ;;  %1821 = vst [vmem:[%s3488_s3 + $0x38] sm:$0xff] %v1693_v4   ;;  %v1758_v59 = vpack.c.bf16 %v1112_v42, %v1111_v41  ;;  %v1763_v51 = vpack.c.bf16 %v1114_v5, %v1113_v32  ;;  %v1768_v43 = vpack.c.bf16 %v1116_v61, %v1115_v46 }
 0x1f3   :  { %1822 = vst [vmem:[%s3488_s3 + $0x40] sm:$0xff] %v1698_v24   ;;  %1823 = vst [vmem:[%s3488_s3 + $0x48] sm:$0xff] %v1703_v25   ;;  %v1773_v21 = vpack.c.bf16 %v1118_v6, %v1117_v1  ;;  %v1778_v10 = vpack.c.bf16 %v1120_v28, %v1119_v31  ;;  %v1783_v37 = vpack.c.bf16 %v1122_v35, %v1121_v7 }
 0x1f4   :  { %1826 = vst [vmem:[%s3488_s3 + $0x60] sm:$0xff] %v1718_v36   ;;  %1827 = vst [vmem:[%s3488_s3 + $0x68] sm:$0xff] %v1723_v29   ;;  %v1788_v12 = vpack.c.bf16 %v1124_v48, %v1123_v62  ;;  %v1793_v15 = vpack.c.bf16 %v1126_v8, %v1125_v50  ;;  %v1798_v14 = vpack.c.bf16 %v1128_v39, %v1127_v55 }
 0x1f5   :  { %1829 = vst [vmem:[%s3488_s3 + $0x78] sm:$0xff] %v1733_v63   ;;  %1830 = vst [vmem:[%s3488_s3 + $0x80] sm:$0xff] %v1738_v2   ;;  %v1803_v49 = vpack.c.bf16 %v1130_v54, %v1129_v53  ;;  %v1808_v30 = vpack.c.bf16 %v1132_v17, %v1131_v26  ;;  %v1813_v27 = vpack.c.bf16 %v1134_v44, %v1133_v0 }
 0x1f6   :  { %1831 = vst [vmem:[%s3488_s3 + $0x88] sm:$0xff] %v1743_v19   ;;  %1832 = vst [vmem:[%s3488_s3 + $0x90] sm:$0xff] %v1748_v18  }
 0x1f7   :  { %1833 = vst [vmem:[%s3488_s3 + $0x98] sm:$0xff] %v1753_v13   ;;  %1834 = vst [vmem:[%s3488_s3 + $0xa0] sm:$0xff] %v1758_v59  }
 0x1f8   :  { %1835 = vst [vmem:[%s3488_s3 + $0xa8] sm:$0xff] %v1763_v51   ;;  %1836 = vst [vmem:[%s3488_s3 + $0xb0] sm:$0xff] %v1768_v43  }
 0x1f9   :  { %1837 = vst [vmem:[%s3488_s3 + $0xb8] sm:$0xff] %v1773_v21   ;;  %1838 = vst [vmem:[%s3488_s3 + $0xc0] sm:$0xff] %v1778_v10  }
 0x1fa   :  { %1839 = vst [vmem:[%s3488_s3 + $0xc8] sm:$0xff] %v1783_v37   ;;  %1840 = vst [vmem:[%s3488_s3 + $0xd0] sm:$0xff] %v1788_v12  }
 0x1fb   :  { %1841 = vst [vmem:[%s3488_s3 + $0xd8] sm:$0xff] %v1793_v15   ;;  %1842 = vst [vmem:[%s3488_s3 + $0xe0] sm:$0xff] %v1798_v14  }
 0x1fc   :  { %1843 = vst [vmem:[%s3488_s3 + $0xe8] sm:$0xff] %v1803_v49   ;;  %1844 = vst [vmem:[%s3488_s3 + $0xf0] sm:$0xff] %v1808_v30  }
 0x1fd   :  { %1845 = vst [vmem:[%s3488_s3 + $0xf8] sm:$0xff] %v1813_v27  }

// kernel: downsampler_forward.5
= control target key start
LH: loop header
LB: loop body
LE: loop exit
PB: predicated region body
PF: predicated region fallthrough
CT: control target
= control target key end

     0   :  { %s837_s1 = inlined_call_operand.vmem [shape: bf16[128,128], index: 1, kind: input, shape index: {}]   ;;  %s838_s0 = inlined_call_operand.vmem [shape: bf16[128,128], index: 0, kind: input, shape index: {}]   ;;  %s839_s2 = inlined_call_operand.vmem [shape: f32[2,128], index: 2, kind: input, shape index: {}]   ;;  %s840_s3 = inlined_call_operand.vmem [shape: bf16[128,128], index: 3, kind: output, shape index: {}]  }
   0x1   :  { %v625_v0 = vld [vmem:[%s837_s1] sm:$0xff]   ;;  %v626_v1 = vld [vmem:[%s837_s1 + $0x8] sm:$0xff]   ;;  %v627_v2 = vld [vmem:[%s837_s1 + $0x10] sm:$0xff]  }
   0x2   :  { %577 = vmatprep.subr.bf16.mxu0 %v625_v0  ;;  %609 = vmatprep.subr.bf16.mxu1 %v625_v0  ;;  %v628_v3 = vld [vmem:[%s837_s1 + $0x18] sm:$0xff]   ;;  %v633_v4 = vld [vmem:[%s838_s0] sm:$0xff]   ;;  %v630_v7 = vld [vmem:[%s837_s1 + $0x28] sm:$0xff]  }
   0x3   :  { %578 = vmatpush3.bf16.msra.mxu0 %v625_v0  ;;  %617 = vmatpush3.bf16.msra.mxu1 %v625_v0  ;;  %v629_v5 = vld [vmem:[%s837_s1 + $0x20] sm:$0xff]   ;;  %v631_v8 = vld [vmem:[%s837_s1 + $0x30] sm:$0xff]   ;;  %v632_v9 = vld [vmem:[%s837_s1 + $0x38] sm:$0xff]  }
   0x4   :  { %579 = vmatprep.subr.bf16.mxu0 %v626_v1  ;;  %610 = vmatprep.subr.bf16.mxu1 %v626_v1  ;;  %v637_v6 = vld [vmem:[%s838_s0 + $0x20] sm:$0xff]   ;;  %v634_v10 = vld [vmem:[%s838_s0 + $0x8] sm:$0xff]   ;;  %v635_v12 = vld [vmem:[%s838_s0 + $0x10] sm:$0xff]  }
   0x5   :  { %593 = vmatprep.mubr.bf16.mxu0 %v633_v4  ;;  %601 = vmatprep.mubr.bf16.mxu1 %v637_v6  ;;  %v638_v11 = vld [vmem:[%s838_s0 + $0x28] sm:$0xff]   ;;  %v639_v13 = vld [vmem:[%s838_s0 + $0x30] sm:$0xff]   ;;  %v636_v14 = vld [vmem:[%s838_s0 + $0x18] sm:$0xff]  }
   0x6   :  { %v640_v15 = vld [vmem:[%s838_s0 + $0x38] sm:$0xff]  }
   0x7   :  { %580 = vmatpush3.bf16.msra.mxu0 %v626_v1  ;;  %618 = vmatpush3.bf16.msra.mxu1 %v626_v1 }
   0x8   :  { %581 = vmatprep.subr.bf16.mxu0 %v627_v2  ;;  %611 = vmatprep.subr.bf16.mxu1 %v627_v2 }
   0xb   :  { %582 = vmatpush3.bf16.msra.mxu0 %v627_v2  ;;  %619 = vmatpush3.bf16.msra.mxu1 %v627_v2 }
   0xc   :  { %583 = vmatprep.subr.bf16.mxu0 %v628_v3  ;;  %612 = vmatprep.subr.bf16.mxu1 %v628_v3 }
   0xf   :  { %584 = vmatpush3.bf16.msra.mxu0 %v628_v3  ;;  %620 = vmatpush3.bf16.msra.mxu1 %v628_v3 }
  0x10   :  { %585 = vmatprep.subr.bf16.mxu0 %v629_v5  ;;  %613 = vmatprep.subr.bf16.mxu1 %v629_v5 }
  0x13   :  { %586 = vmatpush3.bf16.msra.mxu0 %v629_v5  ;;  %621 = vmatpush3.bf16.msra.mxu1 %v629_v5 }
  0x14   :  { %587 = vmatprep.subr.bf16.mxu0 %v630_v7  ;;  %614 = vmatprep.subr.bf16.mxu1 %v630_v7 }
  0x17   :  { %588 = vmatpush3.bf16.msra.mxu0 %v630_v7  ;;  %622 = vmatpush3.bf16.msra.mxu1 %v630_v7 }
  0x18   :  { %589 = vmatprep.subr.bf16.mxu0 %v631_v8  ;;  %615 = vmatprep.subr.bf16.mxu1 %v631_v8 }
  0x1b   :  { %590 = vmatpush3.bf16.msra.mxu0 %v631_v8  ;;  %623 = vmatpush3.bf16.msra.mxu1 %v631_v8 }
  0x1c   :  { %591 = vmatprep.subr.bf16.mxu0 %v632_v9  ;;  %616 = vmatprep.subr.bf16.mxu1 %v632_v9 }
  0x1f   :  { %592 = vmatpush3.bf16.msra.mxu0 %v632_v9  ;;  %624 = vmatpush3.bf16.msra.mxu1 %v632_v9 }
  0x22   :  { %594 = vmatmul.mubr.bf16.vlgmr.msra.gmra.mrb[0].mxu0 %v634_v10  ;;  %602 = vmatmul.mubr.bf16.vlgmr.msra.gmra.mrb[0].mxu1 %v638_v11 }
  0x23   :  { %597 = vmatprep.mubr.bf16.mxu0 %v635_v12  ;;  %605 = vmatprep.mubr.bf16.mxu1 %v639_v13 }
  0x2a   :  { %598 = vmatmul.mubr.bf16.gmra.mrb[4].mxu0 %v636_v14  ;;  %606 = vmatmul.mubr.bf16.gmra.mrb[4].mxu1 %v640_v15 }
  0xf5   :  { %v711_v16 = vpop.f32.mrb[0].mxu0  ;;  %v713_v17 = vpop.f32.mrb[0].mxu1 }
  0xf6   :  { %v715_v18 = vpop.f32.mrb[1].mxu0  ;;  %v717_v19 = vpop.f32.mrb[1].mxu1  ;;  %v263_v27 = vmul.f32 %v711_v16, %v711_v16  ;;  %v271_v59 = vmul.f32 %v713_v17, %v713_v17 }
  0xf7   :  { %v719_v20 = vpop.f32.mrb[2].mxu0  ;;  %v721_v21 = vpop.f32.mrb[2].mxu1  ;;  %v261_v24 = vmul.f32 %v715_v18, %v715_v18  ;;  %v269_v53 = vmul.f32 %v717_v19, %v717_v19 }
  0xf8   :  { %v723_v22 = vpop.f32.mrb[3].mxu0  ;;  %v725_v23 = vpop.f32.mrb[3].mxu1  ;;  %v264_v30 = vmul.f32 %v719_v20, %v719_v20  ;;  %v272_v62 = vmul.f32 %v721_v21, %v721_v21 }
  0xf9   :  { %v240_v25 = vadd.f32 %v723_v22, %v715_v18  ;;  %v262_v26 = vmul.f32 %v723_v22, %v723_v22  ;;  %v270_v58 = vmul.f32 %v725_v23, %v725_v23 }
  0xfb   :  { %v241_v28 = vadd.f32 %v711_v16, %v240_v25  ;;  %v277_v29 = vadd.f32 %v262_v26, %v261_v24 }
  0xfd   :  { %v278_v31 = vadd.f32 %v277_v29, %v263_v27  ;;  %v738_v32 = vpop.f32.mrb[4].mxu0  ;;  %v242_v33 = vadd.f32 %v719_v20, %v241_v28  ;;  %v741_v34 = vpop.f32.mrb[4].mxu1 }
  0xfe   :  { %v743_v35 = vpop.f32.mrb[5].mxu0  ;;  %v745_v36 = vpop.f32.mrb[5].mxu1  ;;  %v267_v47 = vmul.f32 %v738_v32, %v738_v32  ;;  %v275_v7 = vmul.f32 %v741_v34, %v741_v34 }
  0xff   :  { %v243_v37 = vadd.f32 %v242_v33, %v743_v35  ;;  %v265_v38 = vmul.f32 %v743_v35, %v743_v35  ;;  %v279_v39 = vadd.f32 %v278_v31, %v264_v30  ;;  %v750_v40 = vpop.f32.mrb[6].mxu0  ;;  %v752_v41 = vpop.f32.mrb[6].mxu1  ;;  %v273_v1 = vmul.f32 %v745_v36, %v745_v36 }
 0x100   :  { %v754_v42 = vpop.f32.mrb[7].mxu0  ;;  %v756_v43 = vpop.f32.mrb[7].mxu1  ;;  %v268_v50 = vmul.f32 %v750_v40, %v750_v40  ;;  %v276_v10 = vmul.f32 %v752_v41, %v752_v41 }
 0x101   :  { %v280_v44 = vadd.f32 %v279_v39, %v265_v38  ;;  %v244_v45 = vadd.f32 %v243_v37, %v754_v42  ;;  %v266_v46 = vmul.f32 %v754_v42, %v754_v42  ;;  %v274_v6 = vmul.f32 %v756_v43, %v756_v43 }
 0x103   :  { %v245_v48 = vadd.f32 %v738_v32, %v244_v45  ;;  %v281_v49 = vadd.f32 %v280_v44, %v266_v46 }
 0x105   :  { %v282_v51 = vadd.f32 %v281_v49, %v267_v47  ;;  %v246_v52 = vadd.f32 %v750_v40, %v245_v48  ;;  %v310_v48 = vlaneseq }
 0x107   :  { %v247_v54 = vadd.f32 %v246_v52, %v717_v19  ;;  %v283_v55 = vadd.f32 %v282_v51, %v268_v50  ;;  %v311_v49 = vshrl.u32 %v310_v48, 7  ;;  %v305_v50 = vld [vmem:[%s839_s2] sm:$0x1] }
 0x109   :  { %v284_v56 = vadd.f32 %v283_v55, %v269_v53  ;;  %v248_v57 = vadd.f32 %v247_v54, %v725_v23  ;;  %v312_v51 = vsub.s32 0, %v311_v49  ;;  %v306_v54 = vld [vmem:[%s839_s2 + $0x1] sm:$0x1] }
 0x10b   :  { %v249_v60 = vadd.f32 %v713_v17, %v248_v57  ;;  %v285_v61 = vadd.f32 %v284_v56, %v270_v58 }
 0x10d   :  { %v286_v63 = vadd.f32 %v285_v61, %v271_v59  ;;  %v250_v0 = vadd.f32 %v721_v21, %v249_v60 }
 0x10f   :  { %v251_v2 = vadd.f32 %v250_v0, %v745_v36  ;;  %v287_v3 = vadd.f32 %v286_v63, %v272_v62 }
 0x111   :  { %v288_v4 = vadd.f32 %v287_v3, %v273_v1  ;;  %v252_v5 = vadd.f32 %v251_v2, %v756_v43 }
 0x113   :  { %v253_v8 = vadd.f32 %v741_v34, %v252_v5  ;;  %v289_v9 = vadd.f32 %v288_v4, %v274_v6 }
 0x115   :  { %v254_v11 = vadd.f32 %v752_v41, %v253_v8  ;;  %v290_v12 = vadd.f32 %v289_v9, %v275_v7 }
 0x117   :  { %v255_v13 = vrot.slane %v254_v11, 4  ;;  %v291_v14 = vadd.f32 %v290_v12, %v276_v10 }
 0x119   :  { %v256_v15 = vadd.f32 %v255_v13, %v254_v11  ;;  %v292_v24 = vrot.slane %v291_v14, 4 }
 0x11b   :  { %v257_v25 = vrot.slane %v256_v15, 2  ;;  %v293_v26 = vadd.f32 %v292_v24, %v291_v14 }
 0x11d   :  { %v258_v27 = vadd.f32 %v257_v25, %v256_v15  ;;  %v294_v28 = vrot.slane %v293_v26, 2 }
 0x11f   :  { %v259_v29 = vrot.slane %v258_v27, 1  ;;  %v295_v30 = vadd.f32 %v294_v28, %v293_v26 }
 0x121   :  { %v260_v31 = vadd.f32 %v259_v29, %v258_v27  ;;  %v296_v33 = vrot.slane %v295_v30, 1 }
 0x123   :  { %v297_v37 = vadd.f32 %v296_v33, %v295_v30  ;;  %v298_v38 = vmul.f32 0.0078125, %v260_v31 }
 0x125   :  { %v299_v39 = vmul.f32 0.0078125, %v297_v37  ;;  %v300_v44 = vmul.f32 %v298_v38, %v298_v38 }
 0x127   :  { %v301_v45 = vsub.f32 %v299_v39, %v300_v44 }
 0x129   :  { %v302_v46 = vmax.f32 %v301_v45, 0.0 }
 0x12b   :  { %v303_v47 = vadd.f32 1e-05, %v302_v46 }
 0x12d   :  { %641 = vrsqrt.f32 %v303_v47 }
 0x137   :  { %v642_v52 = vpop.eup %641 }
 0x138   :  { %v307_v53 = vmul.f32 %v642_v52, %v305_v50 }
 0x13a   :  { %v308_v55 = vmul.f32 %v307_v53, %v298_v38  ;;  %v313_v56 = vrot.slane %v307_v53, %v312_v51 }
 0x13c   :  { %v309_v57 = vsub.f32 %v306_v54, %v308_v55  ;;  %v314_v58 = vmul.f32 %v313_v56, %v715_v18  ;;  %v315_v59 = vmul.f32 %v313_v56, %v723_v22  ;;  %v316_v60 = vmul.f32 %v711_v16, %v313_v56 }
 0x13d   :  { %v317_v61 = vmul.f32 %v719_v20, %v313_v56  ;;  %v318_v62 = vmul.f32 %v313_v56, %v743_v35  ;;  %v319_v63 = vmul.f32 %v313_v56, %v754_v42  ;;  %v320_v0 = vmul.f32 %v738_v32, %v313_v56 }
 0x13e   :  { %v321_v1 = vmul.f32 %v750_v40, %v313_v56  ;;  %v322_v2 = vmul.f32 %v313_v56, %v717_v19  ;;  %v323_v3 = vmul.f32 %v313_v56, %v725_v23  ;;  %v324_v18 = vmul.f32 %v713_v17, %v313_v56 }
 0x13f   :  { %v325_v22 = vmul.f32 %v721_v21, %v313_v56  ;;  %v326_v16 = vmul.f32 %v313_v56, %v745_v36  ;;  %v327_v20 = vmul.f32 %v313_v56, %v756_v43  ;;  %v328_v35 = vmul.f32 %v741_v34, %v313_v56 }
 0x140   :  { %v329_v42 = vmul.f32 %v752_v41, %v313_v56  ;;  %v333_v4 = vrot.slane %v309_v57, %v312_v51 }
 0x142   :  { %v334_v32 = vadd.f32 %v333_v4, %v314_v58  ;;  %v335_v5 = vadd.f32 %v333_v4, %v315_v59  ;;  %v336_v40 = vadd.f32 %v333_v4, %v316_v60  ;;  %v337_v6 = vadd.f32 %v333_v4, %v317_v61 }
 0x143   :  { %v338_v19 = vadd.f32 %v333_v4, %v318_v62  ;;  %v339_v7 = vadd.f32 %v333_v4, %v319_v63  ;;  %v340_v23 = vadd.f32 %v333_v4, %v320_v0  ;;  %v341_v8 = vadd.f32 %v333_v4, %v321_v1 }
 0x144   :  { %v342_v17 = vadd.f32 %v333_v4, %v322_v2  ;;  %v343_v9 = vadd.f32 %v333_v4, %v323_v3  ;;  %v344_v21 = vadd.f32 %v333_v4, %v324_v18  ;;  %v345_v10 = vadd.f32 %v333_v4, %v325_v22 }
 0x145   :  { %v346_v36 = vadd.f32 %v333_v4, %v326_v16  ;;  %v347_v11 = vadd.f32 %v333_v4, %v327_v20  ;;  %v348_v43 = vadd.f32 %v333_v4, %v328_v35  ;;  %v349_v12 = vadd.f32 %v333_v4, %v329_v42 }
 0x146   :  { %v350_v34 = vmul.f32 0.2, %v334_v32  ;;  %v351_v13 = vmul.f32 0.2, %v335_v5  ;;  %v352_v41 = vmul.f32 0.2, %v336_v40 }
 0x147   :  { %v353_v14 = vmul.f32 0.2, %v337_v6  ;;  %v354_v15 = vmul.f32 0.2, %v338_v19  ;;  %v355_v24 = vmul.f32 0.2, %v339_v7 }
 0x148   :  { %v356_v25 = vmul.f32 0.2, %v340_v23  ;;  %v357_v26 = vmul.f32 0.2, %v341_v8  ;;  %v358_v27 = vmul.f32 0.2, %v342_v17  ;;  %v366_v28 = vmax.f32 %v334_v32, %v350_v34 }
 0x149   :  { %v359_v29 = vmul.f32 0.2, %v343_v9  ;;  %v360_v30 = vmul.f32 0.2, %v344_v21  ;;  %v361_v31 = vmul.f32 0.2, %v345_v10  ;;  %v367_v33 = vmax.f32 %v335_v5, %v351_v13 }
 0x14a   :  { %v362_v37 = vmul.f32 0.2, %v346_v36  ;;  %v363_v38 = vmul.f32 0.2, %v347_v11  ;;  %v364_v39 = vmul.f32 0.2, %v348_v43  ;;  %v368_v44 = vmax.f32 %v336_v40, %v352_v41 }
 0x14b   :  { %v365_v45 = vmul.f32 0.2, %v349_v12  ;;  %v369_v46 = vmax.f32 %v337_v6, %v353_v14  ;;  %v370_v47 = vmax.f32 %v338_v19, %v354_v15  ;;  %v371_v48 = vmax.f32 %v339_v7, %v355_v24 }
 0x14c   :  { %v372_v49 = vmax.f32 %v340_v23, %v356_v25  ;;  %v373_v50 = vmax.f32 %v341_v8, %v357_v26  ;;  %v374_v51 = vmax.f32 %v342_v17, %v358_v27  ;;  %v375_v52 = vmax.f32 %v343_v9, %v359_v29 }
 0x14d   :  { %v376_v53 = vmax.f32 %v344_v21, %v360_v30  ;;  %v377_v54 = vmax.f32 %v345_v10, %v361_v31  ;;  %v378_v55 = vmax.f32 %v346_v36, %v362_v37  ;;  %v379_v56 = vmax.f32 %v347_v11, %v363_v38 }
 0x14e   :  { %v380_v57 = vmax.f32 %v348_v43, %v364_v39  ;;  %v381_v58 = vmax.f32 %v349_v12, %v365_v45  ;;  %v517_v59 = vpack.c.bf16 %v367_v33, %v366_v28  ;;  %v522_v60 = vpack.c.bf16 %v369_v46, %v368_v44 }
 0x14f   :  { %v527_v61 = vpack.c.bf16 %v371_v48, %v370_v47  ;;  %v532_v62 = vpack.c.bf16 %v373_v50, %v372_v49  ;;  %v537_v63 = vpack.c.bf16 %v375_v52, %v374_v51  ;;  %v542_v0 = vpack.c.bf16 %v377_v54, %v376_v53 }
 0x150   :  { %518 = vst [vmem:[%s840_s3] sm:$0xff] %v517_v59   ;;  %554 = vst [vmem:[%s840_s3 + $0x8] sm:$0xff] %v522_v60   ;;  %v547_v1 = vpack.c.bf16 %v379_v56, %v378_v55  ;;  %v552_v2 = vpack.c.bf16 %v381_v58, %v380_v57 }
 0x151   :  { %555 = vst [vmem:[%s840_s3 + $0x10] sm:$0xff] %v527_v61   ;;  %556 = vst [vmem:[%s840_s3 + $0x18] sm:$0xff] %v532_v62  }
 0x152   :  { %557 = vst [vmem:[%s840_s3 + $0x20] sm:$0xff] %v537_v63   ;;  %558 = vst [vmem:[%s840_s3 + $0x28] sm:$0xff] %v542_v0  }
 0x153   :  { %559 = vst [vmem:[%s840_s3 + $0x30] sm:$0xff] %v547_v1   ;;  %560 = vst [vmem:[%s840_s3 + $0x38] sm:$0xff] %v552_v2  }

// kernel: downsampler_forward.6
= control target key start
LH: loop header
LB: loop body
LE: loop exit
PB: predicated region body
PF: predicated region fallthrough
CT: control target
= control target key end

     0   :  { %v250_v60 = vlaneseq  ;;  %s497_s1 = inlined_call_operand.vmem [shape: bf16[256,128], index: 1, kind: input, shape index: {}]   ;;  %s498_s0 = inlined_call_operand.vmem [shape: bf16[32,256], index: 0, kind: input, shape index: {}]   ;;  %s499_s2 = inlined_call_operand.vmem [shape: f32[2,128], index: 2, kind: input, shape index: {}]   ;;  %s500_s3 = inlined_call_operand.vmem [shape: bf16[32,128], index: 3, kind: output, shape index: {}]  }
   0x1   :  { %v381_v0 = vld [vmem:[%s497_s1 + $0x40] sm:$0xff]   ;;  %v383_v2 = vld [vmem:[%s497_s1 + $0x48] sm:$0xff]   ;;  %v385_v4 = vld [vmem:[%s497_s1 + $0x50] sm:$0xff]  }
   0x2   :  { %v382_v1 = vld [vmem:[%s497_s1] sm:$0xff]   ;;  %337 = vmatprep.subr.bf16.mxu0 %v381_v0  ;;  %365 = vmatprep.subr.bf16.mxu1 %v381_v0  ;;  %v384_v3 = vld [vmem:[%s497_s1 + $0x8] sm:$0xff]   ;;  %v386_v5 = vld [vmem:[%s497_s1 + $0x10] sm:$0xff]   ;;  %v251_v61 = vshrl.u32 %v250_v60, 7 }
   0x3   :  { %338 = vmatpush3.bf16.msra.mxu0 %v382_v1  ;;  %373 = vmatpush3.bf16.msra.mxu1 %v382_v1  ;;  %v387_v6 = vld [vmem:[%s497_s1 + $0x58] sm:$0xff]   ;;  %v389_v8 = vld [vmem:[%s497_s1 + $0x60] sm:$0xff]   ;;  %v391_v10 = vld [vmem:[%s497_s1 + $0x68] sm:$0xff]  }
   0x4   :  { %339 = vmatprep.subr.bf16.mxu0 %v383_v2  ;;  %366 = vmatprep.subr.bf16.mxu1 %v383_v2  ;;  %v388_v7 = vld [vmem:[%s497_s1 + $0x18] sm:$0xff]   ;;  %v390_v9 = vld [vmem:[%s497_s1 + $0x20] sm:$0xff]   ;;  %v392_v13 = vld [vmem:[%s497_s1 + $0x28] sm:$0xff]   ;;  %v252_v63 = vsub.s32 0, %v251_v61 }
   0x5   :  { %v399_v11 = vld [vmem:[%s498_s0 + $0x4] ss:$8 sps:$4 sm:$0xff]   ;;  %v402_v12 = vld [vmem:[%s498_s0 + $0x14] ss:$8 sps:$4 sm:$0xff]   ;;  %v397_v18 = vld [vmem:[%s498_s0] ss:$8 sps:$4 sm:$0xff]  }
   0x6   :  { %v393_v14 = vld [vmem:[%s497_s1 + $0x70] sm:$0xff]   ;;  %199 = vmatprep.mubr.bf16.mxu0 %v399_v11  ;;  %207 = vmatprep.mubr.bf16.mxu1 %v402_v12  ;;  %v395_v16 = vld [vmem:[%s497_s1 + $0x78] sm:$0xff]   ;;  %v245_v62 = vld [vmem:[%s499_s2] sm:$0x1] }
   0x7   :  { %340 = vmatpush3.bf16.msra.mxu0 %v384_v3  ;;  %374 = vmatpush3.bf16.msra.mxu1 %v384_v3  ;;  %v394_v15 = vld [vmem:[%s497_s1 + $0x30] sm:$0xff]   ;;  %v396_v17 = vld [vmem:[%s497_s1 + $0x38] sm:$0xff]   ;;  %v246_v2 = vld [vmem:[%s499_s2 + $0x1] sm:$0x1] }
   0x8   :  { %341 = vmatprep.subr.bf16.mxu0 %v385_v4  ;;  %367 = vmatprep.subr.bf16.mxu1 %v385_v4  ;;  %v400_v19 = vld [vmem:[%s498_s0 + $0x10] ss:$8 sps:$4 sm:$0xff]  }
   0xb   :  { %342 = vmatpush3.bf16.msra.mxu0 %v386_v5  ;;  %375 = vmatpush3.bf16.msra.mxu1 %v386_v5 }
   0xc   :  { %343 = vmatprep.subr.bf16.mxu0 %v387_v6  ;;  %368 = vmatprep.subr.bf16.mxu1 %v387_v6 }
   0xf   :  { %344 = vmatpush3.bf16.msra.mxu0 %v388_v7  ;;  %376 = vmatpush3.bf16.msra.mxu1 %v388_v7 }
  0x10   :  { %345 = vmatprep.subr.bf16.mxu0 %v389_v8  ;;  %369 = vmatprep.subr.bf16.mxu1 %v389_v8 }
  0x13   :  { %346 = vmatpush3.bf16.msra.mxu0 %v390_v9  ;;  %377 = vmatpush3.bf16.msra.mxu1 %v390_v9 }
  0x14   :  { %347 = vmatprep.subr.bf16.mxu0 %v391_v10  ;;  %370 = vmatprep.subr.bf16.mxu1 %v391_v10 }
  0x17   :  { %348 = vmatpush3.bf16.msra.mxu0 %v392_v13  ;;  %378 = vmatpush3.bf16.msra.mxu1 %v392_v13 }
  0x18   :  { %349 = vmatprep.subr.bf16.mxu0 %v393_v14  ;;  %371 = vmatprep.subr.bf16.mxu1 %v393_v14 }
  0x1b   :  { %350 = vmatpush3.bf16.msra.mxu0 %v394_v15  ;;  %379 = vmatpush3.bf16.msra.mxu1 %v394_v15 }
  0x1c   :  { %351 = vmatprep.subr.bf16.mxu0 %v395_v16  ;;  %372 = vmatprep.subr.bf16.mxu1 %v395_v16 }
  0x1f   :  { %352 = vmatpush3.bf16.msra.mxu0 %v396_v17  ;;  %380 = vmatpush3.bf16.msra.mxu1 %v396_v17 }
  0x22   :  { %200 = vmatmul.mubr.bf16.vlgmr.msra.gmra.mrb[0].mxu0 %v397_v18  ;;  %208 = vmatmul.mubr.bf16.vlgmr.msra.gmra.mrb[0].mxu1 %v400_v19 }
  0xf5   :  { %v353_v20 = vpop.f32.mrb[0].mxu0  ;;  %v359_v21 = vpop.f32.mrb[0].mxu1 }
  0xf6   :  { %v354_v22 = vpop.f32.mrb[1].mxu0  ;;  %v360_v23 = vpop.f32.mrb[1].mxu1 }
  0xf7   :  { %v355_v24 = vadd.f32 %v354_v22, %v353_v20  ;;  %v356_v25 = vpop.f32.mrb[2].mxu0  ;;  %v361_v26 = vadd.f32 %v360_v23, %v359_v21  ;;  %v362_v27 = vpop.f32.mrb[2].mxu1 }
  0xf8   :  { %v357_v28 = vpop.f32.mrb[3].mxu0  ;;  %v363_v29 = vpop.f32.mrb[3].mxu1 }
  0xf9   :  { %v358_v30 = vadd.f32 %v357_v28, %v356_v25  ;;  %v364_v31 = vadd.f32 %v363_v29, %v362_v27  ;;  %v225_v32 = vmul.f32 %v355_v24, %v355_v24  ;;  %v227_v33 = vmul.f32 %v361_v26, %v361_v26 }
  0xfb   :  { %v216_v34 = vadd.f32 %v358_v30, %v355_v24  ;;  %v226_v35 = vmul.f32 %v358_v30, %v358_v30  ;;  %v228_v39 = vmul.f32 %v364_v31, %v364_v31 }
  0xfd   :  { %v229_v36 = vadd.f32 %v226_v35, %v225_v32  ;;  %v217_v37 = vadd.f32 %v361_v26, %v216_v34 }
  0xff   :  { %v218_v38 = vadd.f32 %v364_v31, %v217_v37  ;;  %v230_v40 = vadd.f32 %v229_v36, %v227_v33 }
 0x101   :  { %v219_v41 = vrot.slane %v218_v38, 4  ;;  %v231_v42 = vadd.f32 %v230_v40, %v228_v39 }
 0x103   :  { %v220_v43 = vadd.f32 %v219_v41, %v218_v38  ;;  %v232_v44 = vrot.slane %v231_v42, 4 }
 0x105   :  { %v221_v45 = vrot.slane %v220_v43, 2  ;;  %v233_v46 = vadd.f32 %v232_v44, %v231_v42 }
 0x107   :  { %v222_v47 = vadd.f32 %v221_v45, %v220_v43  ;;  %v234_v48 = vrot.slane %v233_v46, 2 }
 0x109   :  { %v223_v49 = vrot.slane %v222_v47, 1  ;;  %v235_v50 = vadd.f32 %v234_v48, %v233_v46 }
 0x10b   :  { %v224_v51 = vadd.f32 %v223_v49, %v222_v47  ;;  %v236_v52 = vrot.slane %v235_v50, 1 }
 0x10d   :  { %v237_v53 = vadd.f32 %v236_v52, %v235_v50  ;;  %v238_v54 = vmul.f32 0.03125, %v224_v51 }
 0x10f   :  { %v239_v55 = vmul.f32 0.03125, %v237_v53  ;;  %v240_v56 = vmul.f32 %v238_v54, %v238_v54 }
 0x111   :  { %v241_v57 = vsub.f32 %v239_v55, %v240_v56 }
 0x113   :  { %v242_v58 = vmax.f32 %v241_v57, 0.0 }
 0x115   :  { %v243_v59 = vadd.f32 1e-05, %v242_v58 }
 0x117   :  { %403 = vrsqrt.f32 %v243_v59 }
 0x121   :  { %v404_v0 = vpop.eup %403 }
 0x122   :  { %v247_v1 = vmul.f32 %v404_v0, %v245_v62 }
 0x124   :  { %v248_v3 = vmul.f32 %v247_v1, %v238_v54  ;;  %v253_v4 = vrot.slane %v247_v1, %v252_v63 }
 0x126   :  { %v249_v5 = vsub.f32 %v246_v2, %v248_v3  ;;  %v254_v6 = vmul.f32 %v355_v24, %v253_v4  ;;  %v255_v7 = vmul.f32 %v358_v30, %v253_v4  ;;  %v256_v8 = vmul.f32 %v361_v26, %v253_v4 }
 0x127   :  { %v257_v9 = vmul.f32 %v364_v31, %v253_v4 }
 0x128   :  { %v261_v10 = vrot.slane %v249_v5, %v252_v63 }
 0x12a   :  { %v262_v11 = vadd.f32 %v261_v10, %v254_v6  ;;  %v263_v12 = vadd.f32 %v261_v10, %v255_v7  ;;  %v264_v13 = vadd.f32 %v261_v10, %v256_v8  ;;  %v265_v14 = vadd.f32 %v261_v10, %v257_v9 }
 0x12c   :  { %v266_v15 = vmul.f32 0.2, %v262_v11  ;;  %v267_v16 = vmul.f32 0.2, %v263_v12  ;;  %v268_v17 = vmul.f32 0.2, %v264_v13 }
 0x12d   :  { %v269_v18 = vmul.f32 0.2, %v265_v14 }
 0x12e   :  { %v270_v19 = vmax.f32 %v262_v11, %v266_v15  ;;  %v271_v20 = vmax.f32 %v263_v12, %v267_v16  ;;  %v272_v21 = vmax.f32 %v264_v13, %v268_v17 }
 0x12f   :  { %v273_v22 = vmax.f32 %v265_v14, %v269_v18 }
 0x130   :  { %v329_v23 = vpack.c.bf16 %v271_v20, %v270_v19 }
 0x131   :  { %v334_v25 = vpack.c.bf16 %v273_v22, %v272_v21 }
 0x132   :  { %330 = vst [vmem:[%s500_s3] sm:$0xff] %v329_v23  }
 0x133   :  { %336 = vst [vmem:[%s500_s3 + $0x8] sm:$0xff] %v334_v25  }

// kernel: downsampler_forward.7
= control target key start
LH: loop header
LB: loop body
LE: loop exit
PB: predicated region body
PF: predicated region fallthrough
CT: control target
= control target key end

     0   :  { %s702_s0 = inlined_call_operand.vmem [shape: bf16[8,512], index: 0, kind: input, shape index: {}]   ;;  %s703_s1 = inlined_call_operand.vmem [shape: bf16[512,128], index: 1, kind: input, shape index: {}]   ;;  %s704_s2 = inlined_call_operand.vmem [shape: f32[2,128], index: 2, kind: input, shape index: {}]   ;;  %s705_s3 = inlined_call_operand.hbm [shape: f32[8,128], index: 3, kind: output, shape index: {}]  }
   0x1   :  { %v499_v0 = vld [vmem:[%s703_s1 + $0x40] sm:$0xff]   ;;  %v503_v4 = vld [vmem:[%s703_s1 + $0x48] sm:$0xff]   ;;  %v507_v8 = vld [vmem:[%s703_s1 + $0x50] sm:$0xff]  }
   0x2   :  { %v500_v1 = vld [vmem:[%s703_s1 + $0xc0] sm:$0xff]   ;;  %454 = vmatprep.subr.bf16.mxu0 %v499_v0  ;;  %v504_v5 = vld [vmem:[%s703_s1 + $0xc8] sm:$0xff]   ;;  %v508_v9 = vld [vmem:[%s703_s1 + $0xd0] sm:$0xff]  }
   0x3   :  { %v501_v2 = vld [vmem:[%s703_s1] sm:$0xff]   ;;  %476 = vmatprep.subr.bf16.mxu1 %v500_v1  ;;  %v505_v6 = vld [vmem:[%s703_s1 + $0x8] sm:$0xff]   ;;  %v509_v10 = vld [vmem:[%s703_s1 + $0x10] sm:$0xff]  }
   0x4   :  { %v502_v3 = vld [vmem:[%s703_s1 + $0x80] sm:$0xff]   ;;  %455 = vmatpush3.bf16.msra.mxu0 %v501_v2  ;;  %v506_v7 = vld [vmem:[%s703_s1 + $0x88] sm:$0xff]   ;;  %v510_v11 = vld [vmem:[%s703_s1 + $0x90] sm:$0xff]  }
   0x5   :  { %477 = vmatpush3.bf16.msra.mxu1 %v502_v3  ;;  %456 = vmatprep.subr.bf16.mxu0 %v503_v4  ;;  %v511_v12 = vld [vmem:[%s703_s1 + $0x58] sm:$0xff]   ;;  %v515_v16 = vld [vmem:[%s703_s1 + $0x60] sm:$0xff]   ;;  %v519_v20 = vld [vmem:[%s703_s1 + $0x68] sm:$0xff]  }
   0x6   :  { %478 = vmatprep.subr.bf16.mxu1 %v504_v5  ;;  %v512_v13 = vld [vmem:[%s703_s1 + $0xd8] sm:$0xff]   ;;  %v516_v17 = vld [vmem:[%s703_s1 + $0xe0] sm:$0xff]   ;;  %v520_v21 = vld [vmem:[%s703_s1 + $0xe8] sm:$0xff]  }
   0x7   :  { %v513_v14 = vld [vmem:[%s703_s1 + $0x18] sm:$0xff]   ;;  %v517_v18 = vld [vmem:[%s703_s1 + $0x20] sm:$0xff]   ;;  %v521_v22 = vld [vmem:[%s703_s1 + $0x28] sm:$0xff]  }
   0x8   :  { %457 = vmatpush3.bf16.msra.mxu0 %v505_v6  ;;  %v514_v15 = vld [vmem:[%s703_s1 + $0x98] sm:$0xff]   ;;  %v518_v19 = vld [vmem:[%s703_s1 + $0xa0] sm:$0xff]   ;;  %v522_v23 = vld [vmem:[%s703_s1 + $0xa8] sm:$0xff]  }
   0x9   :  { %479 = vmatpush3.bf16.msra.mxu1 %v506_v7  ;;  %458 = vmatprep.subr.bf16.mxu0 %v507_v8  ;;  %v523_v24 = vld [vmem:[%s703_s1 + $0x70] sm:$0xff]   ;;  %v527_v28 = vld [vmem:[%s703_s1 + $0x78] sm:$0xff]   ;;  %v16_v32 = vld [vmem:[%s702_s0] sm:$0xff] }
   0xa   :  { %480 = vmatprep.subr.bf16.mxu1 %v508_v9  ;;  %v524_v25 = vld [vmem:[%s703_s1 + $0xf0] sm:$0xff]   ;;  %v528_v29 = vld [vmem:[%s703_s1 + $0xf8] sm:$0xff]   ;;  %v17_v33 = vld [vmem:[%s702_s0 + $0x8] sm:$0xff] }
   0xb   :  { %v525_v26 = vld [vmem:[%s703_s1 + $0x30] sm:$0xff]   ;;  %v529_v30 = vld [vmem:[%s703_s1 + $0x38] sm:$0xff]  }
   0xc   :  { %459 = vmatpush3.bf16.msra.mxu0 %v509_v10  ;;  %v526_v27 = vld [vmem:[%s703_s1 + $0xb0] sm:$0xff]   ;;  %v530_v31 = vld [vmem:[%s703_s1 + $0xb8] sm:$0xff]  }
   0xd   :  { %481 = vmatpush3.bf16.msra.mxu1 %v510_v11  ;;  %460 = vmatprep.subr.bf16.mxu0 %v511_v12 }
   0xe   :  { %482 = vmatprep.subr.bf16.mxu1 %v512_v13 }
  0x10   :  { %461 = vmatpush3.bf16.msra.mxu0 %v513_v14 }
  0x11   :  { %483 = vmatpush3.bf16.msra.mxu1 %v514_v15  ;;  %462 = vmatprep.subr.bf16.mxu0 %v515_v16 }
  0x12   :  { %484 = vmatprep.subr.bf16.mxu1 %v516_v17 }
  0x14   :  { %463 = vmatpush3.bf16.msra.mxu0 %v517_v18 }
  0x15   :  { %485 = vmatpush3.bf16.msra.mxu1 %v518_v19  ;;  %464 = vmatprep.subr.bf16.mxu0 %v519_v20 }
  0x16   :  { %486 = vmatprep.subr.bf16.mxu1 %v520_v21 }
  0x18   :  { %465 = vmatpush3.bf16.msra.mxu0 %v521_v22 }
  0x19   :  { %487 = vmatpush3.bf16.msra.mxu1 %v522_v23  ;;  %466 = vmatprep.subr.bf16.mxu0 %v523_v24 }
  0x1a   :  { %488 = vmatprep.subr.bf16.mxu1 %v524_v25 }
  0x1c   :  { %467 = vmatpush3.bf16.msra.mxu0 %v525_v26 }
  0x1d   :  { %489 = vmatpush3.bf16.msra.mxu1 %v526_v27  ;;  %468 = vmatprep.subr.bf16.mxu0 %v527_v28 }
  0x1e   :  { %490 = vmatprep.subr.bf16.mxu1 %v528_v29 }
  0x20   :  { %469 = vmatpush3.bf16.msra.mxu0 %v529_v30 }
  0x21   :  { %8 = vsyncpa [#allocation3], 0  ;;  %491 = vmatpush3.bf16.msra.mxu1 %v530_v31  ;;  %v418_v34 = vcombine.low %v16_v32, %v16_v32  ;;  %v419_v35 = vcombine.high %v16_v32, %v16_v32  ;;  %v420_v36 = vcombine.low %v17_v33, %v17_v33  ;;  %v421_v37 = vcombine.high %v17_v33, %v17_v33  ;;  %v388_v6 = vld [vmem:[%s704_s2] sm:$0x1]  ;;  %v389_v10 = vld [vmem:[%s704_s2 + $0x1] sm:$0x1] }
  0x22   :  { %v393_v4 = vlaneseq  ;;  %s561_s28 = smov [#allocation2]  }
  0x23   :  { %320 = vmatprep.mubr.bf16.mxu0 %v419_v35  ;;  %360 = vmatprep.mubr.bf16.mxu1 %v421_v37  ;;  %s410_s29 = sshll.u32 %s561_s28, 4  ;;  %s411_s29 = int_to_ptr.vmem [resolvable:$true] %s410_s29 }
  0x24   :  { %321 = vmatmul.mubr.bf16.vlgmr.msra.gmra.mrb[0].mxu0 %v418_v34  ;;  %361 = vmatmul.mubr.bf16.vlgmr.msra.gmra.mrb[0].mxu1 %v420_v36  ;;  %v394_v5 = vshrl.u32 %v393_v4, 7  ;;  %s537_s30 = scalar_lea.vmem %s411_s29, 128  ;;  %p542_p1 = scmp.lt.s32.totalorder %s411_s29, %s411_s29 }
  0x25   :  { %p538_p0 = scmp.ne.s32.totalorder %s411_s29, %s537_s30  ;;  %p543_p2 = scmp.lt.s32.totalorder %s537_s30, %s537_s30 }
  0x26   :  { %v395_v7 = vsub.s32 0, %v394_v5 }
  0x27   :  { %p544_p3 = por %p543_p2, %p542_p1 }
  0x29   :  { %p545_p4 = pnand %p544_p3, %p538_p0 }
  0xf7   :  { %v470_v38 = vpop.f32.mrb[0].mxu0  ;;  %v492_v39 = vpop.f32.mrb[0].mxu1 }
  0xf8   :  { %v471_v40 = vpop.f32.mrb[1].mxu0  ;;  %v493_v41 = vpop.f32.mrb[1].mxu1 }
  0xf9   :  { %v472_v42 = vadd.f32 %v471_v40, %v470_v38  ;;  %v494_v43 = vadd.f32 %v493_v41, %v492_v39  ;;  %v473_v44 = vpop.f32.mrb[2].mxu0  ;;  %v495_v45 = vpop.f32.mrb[2].mxu1 }
  0xfa   :  { %v474_v46 = vpop.f32.mrb[3].mxu0  ;;  %v496_v47 = vpop.f32.mrb[3].mxu1 }
  0xfb   :  { %v363_v48 = vadd.f32 %v494_v43, %v472_v42 }
  0xfd   :  { %v368_v49 = vrot.slane %v363_v48, 4  ;;  %v374_v50 = vmul.f32 %v363_v48, %v363_v48 }
  0xff   :  { %v369_v51 = vadd.f32 %v368_v49, %v363_v48  ;;  %v375_v52 = vrot.slane %v374_v50, 4 }
 0x101   :  { %v370_v53 = vrot.slane %v369_v51, 2  ;;  %v376_v54 = vadd.f32 %v375_v52, %v374_v50 }
 0x103   :  { %v371_v55 = vadd.f32 %v370_v53, %v369_v51  ;;  %v377_v56 = vrot.slane %v376_v54, 2 }
 0x105   :  { %v378_v57 = vadd.f32 %v377_v56, %v376_v54  ;;  %v372_v58 = vrot.slane %v371_v55, 1 }
 0x107   :  { %v379_v59 = vrot.slane %v378_v57, 1  ;;  %v373_v60 = vadd.f32 %v372_v58, %v371_v55 }
 0x109   :  { %v380_v61 = vadd.f32 %v379_v59, %v378_v57  ;;  %v381_v62 = vmul.f32 0.125, %v373_v60 }
 0x10b   :  { %v382_v63 = vmul.f32 0.125, %v380_v61  ;;  %v383_v0 = vmul.f32 %v381_v62, %v381_v62 }
 0x10d   :  { %v384_v1 = vsub.f32 %v382_v63, %v383_v0 }
 0x10f   :  { %v385_v2 = vmax.f32 %v384_v1, 0.0 }
 0x111   :  { %v386_v3 = vadd.f32 1e-05, %v385_v2 }
 0x113   :  { %535 = vrsqrt.f32 %v386_v3 }
 0x11d   :  { %v536_v8 = vpop.eup %535 }
 0x11e   :  { %v390_v9 = vmul.f32 %v536_v8, %v388_v6 }
 0x120   :  { %v391_v11 = vmul.f32 %v390_v9, %v381_v62  ;;  %v396_v12 = vrot.slane %v390_v9, %v395_v7 }
 0x122   :  { %v392_v13 = vsub.f32 %v389_v10, %v391_v11  ;;  %v397_v14 = vmul.f32 %v396_v12, %v363_v48 }
 0x124   :  { %v401_v15 = vrot.slane %v392_v13, %v395_v7 }
 0x126   :  { %v402_v16 = vadd.f32 %v401_v15, %v397_v14 }
 0x128   :  { %403 = vst [vmem:[#allocation2] sm:$0xff] %v402_v16 }
 0x129   :  { %548 = shalt.err (!%p545_p4)
}
 0x12a   :  { %s549_s2 = scalar_lea.hbm %s705_s3, 128 }
 0x12b   :  { %p550_p5 = scmp.ne.s32.totalorder %s705_s3, %s549_s2  ;;  %p553_p6 = scmp.lt.u32.totalorder %s549_s2, %s705_s3 }
 0x12d   :  { %p555_p7 = pnand %p553_p6, %p550_p5 }
 0x12f   :  { %558 = shalt.err (!%p555_p7)
}
 0x130   :  { %413 = dma.vmem_to_hbm [thread:$0]  %s411_s29, 128, %s705_s3, [#allocation3]  }
 0x131   :  { %559 = dma.done.wait [#allocation3], 128  }
 0x132   :  { %560 = vsyncadd [#allocation3], 4294967168 }
 0x133   :  { %417 = vsyncpa [#allocation3], 1 }

</bundles_post_ra>
